<compile_context>
chip_gen: v7x
topology: tpu7x:2x2x1
jax: 0.10.0
libtpu: 0.0.40
codegen_flags: <defaults>
</compile_context>

<pallas_src>
import math
import functools

import jax
import jax.numpy as jnp
from jax import lax
from jax.experimental import pallas as pl
from jax.experimental.pallas import tpu as pltpu


# ----------------------------------------------------------------------------
# Kernel 1: per-batch GroupNorm32 + full QKV projection
# ----------------------------------------------------------------------------
def _gn_qkv_kernel(x_ref, gmat_ref, gnw_ref, gnb_ref, wqkv_ref, bqkv_ref,
                   qkv_ref, *, eps, t_real, compute_dtype, mask_pad, precision):
    x = x_ref[0].astype(jnp.float32)                          # [C, Tp]
    C, Tp = x.shape
    cnt = float((C // gmat_ref.shape[0]) * 0 + 0)             # placeholder (set below)
    del cnt
    # number of channels per group * real T
    cpg_total = t_real  # used below with group size folded into gmat row-sums
    del cpg_total

    # ---- statistics (float32, real T only; pads are zero so sums are exact) ----
    ch_sum = jnp.sum(x, axis=1, keepdims=True)                # [C, 1] lane reduce
    # group-broadcast sum: gmat is block-diagonal ones over channels of a group
    grp_sum = lax.dot_general(gmat_ref[...], ch_sum, (((1,), (0,)), ((), ())),
                              preferred_element_type=jnp.float32,
                              precision=precision)            # [C, 1]
    # gmat row-sum == channels_per_group (constant), so count = cpg * t_real
    cpg = gmat_ref.shape[1] and int(0) or 0                   # (not used; cnt passed via gmat)
    del cpg
    # channels_per_group is gmat's row sum; it is constant so fold it statically:
    # (passed implicitly: gmat has exactly C//num_groups ones per row)
    n_per_group = int(gmat_ref.shape[0])  # placeholder, replaced by static arg below
    del n_per_group
    raise_placeholder = False
    assert not raise_placeholder
    # NOTE: real count is provided through the closure variable `_GN_COUNT`
    cnt = _GN_COUNT[0]
    mean_c = grp_sum / cnt                                    # [C, 1]
    diff = x - mean_c
    sq = diff * diff
    if mask_pad:
        col = lax.broadcasted_iota(jnp.int32, (1, Tp), 1)
        sq = jnp.where(col < t_real, sq, 0.0)
    ch_sq = jnp.sum(sq, axis=1, keepdims=True)                # [C, 1]
    var_c = lax.dot_general(gmat_ref[...], ch_sq, (((1,), (0,)), ((), ())),
                            preferred_element_type=jnp.float32,
                            precision=precision) / cnt        # [C, 1]
    rstd_c = lax.rsqrt(var_c + eps)

    # affine fused; produce the MXU operand directly in compute dtype
    xn = ((diff * rstd_c) * gnw_ref[...] + gnb_ref[...]).astype(compute_dtype)

    # ---- full QKV projection: [3C, C] @ [C, Tp] ----
    qkv = lax.dot_general(wqkv_ref[...].astype(compute_dtype), xn,
                          (((1,), (0,)), ((), ())),
                          preferred_element_type=jnp.float32,
                          precision=precision)                # [3C, Tp] f32
    qkv_ref[0] = (qkv + bqkv_ref[...]).astype(qkv_ref.dtype)


# The GroupNorm element count (channels_per_group * real_T) is trace-time
# static; it is communicated to the kernel through this single-element list so
# the kernel body above stays a plain function (set right before pallas_call).
_GN_COUNT = [1.0]


# ----------------------------------------------------------------------------
# Kernel 2: flash attention over (batch, head, query-tile) grid
# ----------------------------------------------------------------------------
def _attention_kernel(q_ref, k_ref, v_ref, a_ref, *, ch, t_real, key_tile,
                      n_full_tiles, mask_last, compute_dtype, approx_recip,
                      precision):
    cd = compute_dtype
    tq = q_ref.shape[2]
    scale2 = 1.0 / math.sqrt(ch)                              # (ch**-0.25)**2 folded into q
    q = (q_ref[0].astype(jnp.float32) * scale2).astype(cd)    # [ch, tq]

    def tile_step(lo, m, l, acc, do_mask):
        k_blk = k_ref[0, :, pl.ds(lo, key_tile)].astype(cd)   # [ch, kt]
        v_blk = v_ref[0, :, pl.ds(lo, key_tile)].astype(cd)   # [ch, kt]
        # s[s, t] = sum_c k[c, s] * q[c, t]   (keys on sublanes, no transpose)
        s = lax.dot_general(k_blk, q, (((0,), (0,)), ((), ())),
                            preferred_element_type=jnp.float32,
                            precision=precision)              # [kt, tq]
        if do_mask:
            key_idx = lo + lax.broadcasted_iota(jnp.int32, (key_tile, 1), 0)
            s = jnp.where(key_idx < t_real, s, -1e30)
        m_new = jnp.maximum(m, jnp.max(s, axis=0, keepdims=True))   # [1, tq]
        alpha = jnp.exp(m - m_new)
        p = jnp.exp(s - m_new)                                # [kt, tq] f32
        l_new = alpha * l + jnp.sum(p, axis=0, keepdims=True)
        # pv[c, t] = sum_s v[c, s] * p[s, t]
        pv = lax.dot_general(v_blk, p.astype(cd), (((1,), (0,)), ((), ())),
                             preferred_element_type=jnp.float32,
                             precision=precision)             # [ch, tq]
        return m_new, l_new, alpha * acc + pv

    m = jnp.full((1, tq), -jnp.inf, jnp.float32)
    l = jnp.zeros((1, tq), jnp.float32)
    acc = jnp.zeros((ch, tq), jnp.float32)

    if n_full_tiles > 2:                                      # bounded liveness
        def body(j, carry):
            lo = pl.multiple_of(j * key_tile, key_tile)
            return tile_step(lo, *carry, do_mask=False)
        m, l, acc = lax.fori_loop(0, n_full_tiles, body, (m, l, acc))
    else:                                                     # short: unroll at trace time
        for j in range(n_full_tiles):
            m, l, acc = tile_step(j * key_tile, m, l, acc, do_mask=False)

    if mask_last:                                             # only the boundary tile is masked
        m, l, acc = tile_step(n_full_tiles * key_tile, m, l, acc, do_mask=True)

    inv_l = pl.reciprocal(l, approx=True) if approx_recip else 1.0 / l
    a_ref[0] = (acc * inv_l).astype(a_ref.dtype)


# ----------------------------------------------------------------------------
# Kernel 3: T-tiled  out = x + Wproj @ a + bproj
# ----------------------------------------------------------------------------
def _proj_residual_kernel(x_ref, a_ref, wproj_ref, bproj_ref, o_ref, *,
                          compute_dtype, precision):
    cd = compute_dtype
    h = lax.dot_general(wproj_ref[...].astype(cd), a_ref[0].astype(cd),
                        (((1,), (0,)), ((), ())),
                        preferred_element_type=jnp.float32,
                        precision=precision)                  # [C, tt]
    o_ref[0] = (x_ref[0].astype(jnp.float32) + h + bproj_ref[...]).astype(o_ref.dtype)


# ----------------------------------------------------------------------------
# Helpers
# ----------------------------------------------------------------------------
def _vmem_cap_bytes():
    try:
        return int(pltpu.get_tpu_info().vmem_capacity_bytes)
    except Exception:
        return 128 << 20


def _pick_tile(total, preferred, candidates):
    opts = ([] if preferred is None else [int(preferred)]) + list(candidates)
    for c in opts:
        if 128 <= c <= total and total % c == 0 and c % 128 == 0:
            return c
    return total


def _clamp_vmem(estimate, cap):
    hi = int(0.9 * cap)
    return int(max(min(int(1.5 * estimate), hi), min(32 << 20, hi)))


# ----------------------------------------------------------------------------
# Wrapper
# ----------------------------------------------------------------------------
def attention_block(x, params, *, num_heads, num_groups=32, eps=1e-5,
                    compute_dtype=jnp.float32, key_tile=None, q_tile=None,
                    t_tile=None):
    """x: [B, C, H, W] (NCHW). Returns [B, C, H, W]."""
    B, C, H, W = x.shape
    T = H * W
    assert C % num_groups == 0, "GroupNorm32 requires channels % num_groups == 0"
    assert C % num_heads == 0
    ch = C // num_heads
    assert ch % 8 == 0, "head channels must be a multiple of 8 (sublane alignment)"

    Tp = ((T + 127) // 128) * 128                             # lane-dense padded T
    x_flat = x.reshape(B, C, T)
    if Tp != T:
        # GroupNorm sums rely on the pads being exactly zero.
        x_flat = jnp.pad(x_flat, ((0, 0), (0, 0), (0, Tp - T)))

    use_bf16 = (compute_dtype == jnp.bfloat16)
    cd = jnp.bfloat16 if use_bf16 else jnp.float32
    prec = None if use_bf16 else lax.Precision.HIGHEST
    ib = 2 if use_bf16 else 4                                 # intermediate/weight bytes
    xb = x.dtype.itemsize

    cap = _vmem_cap_bytes()
    small_vmem = cap < (96 << 20)                             # v7x: 64 MiB / TensorCore
    kt = _pick_tile(Tp, key_tile, (256, 128) if small_vmem else (512, 256, 128))
    tq = _pick_tile(Tp, q_tile, (512, 256, 128) if small_vmem else (1024, 512, 256, 128))
    tt = _pick_tile(Tp, t_tile, (1024, 512, 256, 128) if small_vmem else (2048, 1024, 512, 256, 128))

    gnw = params["gn_w"].reshape(C, 1).astype(jnp.float32)
    gnb = params["gn_b"].reshape(C, 1).astype(jnp.float32)
    wqkv = params["w_qkv"].reshape(3 * C, C).astype(cd)
    bqkv = params["b_qkv"].reshape(3 * C, 1).astype(jnp.float32)
    wproj = params["w_proj"].reshape(C, C).astype(cd)
    bproj = params["b_proj"].reshape(C, 1).astype(jnp.float32)

    # block-diagonal group-membership matrix (ones within a group)
    gidx = jnp.arange(C, dtype=jnp.int32) // (C // num_groups)
    group_mat = (gidx[:, None] == gidx[None, :]).astype(jnp.float32)   # [C, C]

    # ---- kernel 1: GroupNorm + full QKV projection (per batch) ------------
    _GN_COUNT[0] = float((C // num_groups) * T)
    est1 = (2 * C * Tp * xb + 2 * 3 * C * Tp * ib + 2 * 3 * C * C * ib
            + 2 * C * C * 4 + 4 * C * Tp * 4 + 3 * C * Tp * 4)
    qkv = pl.pallas_call(
        functools.partial(_gn_qkv_kernel, eps=eps, t_real=T, compute_dtype=cd,
                          mask_pad=(Tp != T), precision=prec),
        out_shape=jax.ShapeDtypeStruct((B, 3 * C, Tp), cd),
        grid_spec=pltpu.PrefetchScalarGridSpec(
            num_scalar_prefetch=0,
            grid=(B,),
            in_specs=[
                pl.BlockSpec((1, C, Tp), lambda b: (b, 0, 0)),       # x
                pl.BlockSpec((C, C), lambda b: (0, 0)),              # group matrix
                pl.BlockSpec((C, 1), lambda b: (0, 0)),              # gn weight
                pl.BlockSpec((C, 1), lambda b: (0, 0)),              # gn bias
                pl.BlockSpec((3 * C, C), lambda b: (0, 0)),          # qkv weight
                pl.BlockSpec((3 * C, 1), lambda b: (0, 0)),          # qkv bias
            ],
            out_specs=pl.BlockSpec((1, 3 * C, Tp), lambda b: (b, 0, 0)),
        ),
        compiler_params=pltpu.CompilerParams(
            dimension_semantics=("parallel",),
            vmem_limit_bytes=_clamp_vmem(est1, cap)),
    )(x_flat, group_mat, gnw, gnb, wqkv, bqkv)

    # ---- kernel 2: flash attention over (batch, head, query tile) ---------
    n_kt = Tp // kt
    mask_last = (Tp != T)                                      # pads live only in the last tile
    n_full = n_kt - 1 if mask_last else n_kt
    est2 = (2 * ch * tq * ib + 4 * ch * Tp * ib + 2 * ch * tq * ib
            + 4 * kt * tq * 4 + 3 * ch * tq * 4 + 2 * ch * kt * ib)
    a = pl.pallas_call(
        functools.partial(_attention_kernel, ch=ch, t_real=T, key_tile=kt,
                          n_full_tiles=n_full, mask_last=mask_last,
                          compute_dtype=cd, approx_recip=use_bf16,
                          precision=prec),
        out_shape=jax.ShapeDtypeStruct((B, C, Tp), cd),
        grid_spec=pltpu.PrefetchScalarGridSpec(
            num_scalar_prefetch=0,
            grid=(B, num_heads, Tp // tq),
            in_specs=[
                pl.BlockSpec((1, ch, tq), lambda b, h, qi: (b, 3 * h, qi)),      # q
                pl.BlockSpec((1, ch, Tp), lambda b, h, qi: (b, 3 * h + 1, 0)),   # k
                pl.BlockSpec((1, ch, Tp), lambda b, h, qi: (b, 3 * h + 2, 0)),   # v
            ],
            out_specs=pl.BlockSpec((1, ch, tq), lambda b, h, qi: (b, h, qi)),
        ),
        compiler_params=pltpu.CompilerParams(
            dimension_semantics=("parallel", "parallel", "parallel"),
            vmem_limit_bytes=_clamp_vmem(est2, cap)),
    )(qkv, qkv, qkv)

    # ---- kernel 3: proj_out + residual, T-tiled ----------------------------
    est3 = (2 * C * tt * xb + 2 * C * tt * ib + 2 * C * C * ib
            + 2 * C * tt * xb + 2 * C * tt * 4)
    out = pl.pallas_call(
        functools.partial(_proj_residual_kernel, compute_dtype=cd, precision=prec),
        out_shape=jax.ShapeDtypeStruct((B, C, Tp), x.dtype),
        grid_spec=pltpu.PrefetchScalarGridSpec(
            num_scalar_prefetch=0,
            grid=(B, Tp // tt),
            in_specs=[
                pl.BlockSpec((1, C, tt), lambda b, ti: (b, 0, ti)),   # x (residual)
                pl.BlockSpec((1, C, tt), lambda b, ti: (b, 0, ti)),   # attention output
                pl.BlockSpec((C, C), lambda b, ti: (0, 0)),           # proj weight
                pl.BlockSpec((C, 1), lambda b, ti: (0, 0)),           # proj bias
            ],
            out_specs=pl.BlockSpec((1, C, tt), lambda b, ti: (b, 0, ti)),
        ),
        compiler_params=pltpu.CompilerParams(
            dimension_semantics=("parallel", "parallel"),
            vmem_limit_bytes=_clamp_vmem(est3, cap)),
    )(x_flat, a, wproj, bproj)

    return out[:, :, :T].reshape(B, C, H, W)


# ----------------------------------------------------------------------------
# Pure-JAX reference replicating the PyTorch forward (for the self-test)
# ----------------------------------------------------------------------------
def attention_block_reference(x, params, *, num_heads, num_groups=32, eps=1e-5):
    B, C, H, W = x.shape
    T = H * W
    hp = lax.Precision.HIGHEST
    xf = x.reshape(B, C, T).astype(jnp.float32)
    x3 = xf.reshape(B, num_groups, C // num_groups, T)
    mean = x3.mean(axis=(2, 3), keepdims=True)
    var = ((x3 - mean) ** 2).mean(axis=(2, 3), keepdims=True)
    xn = ((x3 - mean) / jnp.sqrt(var + eps)).reshape(B, C, T)
    xn = xn * params["gn_w"][None, :, None] + params["gn_b"][None, :, None]
    qkv = jnp.einsum("oc,bct->bot", params["w_qkv"], xn, precision=hp)
    qkv = qkv + params["b_qkv"][None, :, None]
    ch = C // num_heads
    qkv_h = qkv.reshape(B * num_heads, 3 * ch, T)
    q, k, v = qkv_h[:, :ch], qkv_h[:, ch:2 * ch], qkv_h[:, 2 * ch:]
    scale = 1.0 / math.sqrt(math.sqrt(ch))
    w = jnp.einsum("bct,bcs->bts", q * scale, k * scale, precision=hp)
    w = jax.nn.softmax(w.astype(jnp.float32), axis=-1)
    a = jnp.einsum("bts,bcs->bct", w, v, precision=hp).reshape(B, C, T)
    hproj = jnp.einsum("oc,bct->bot", params["w_proj"], a, precision=hp)
    hproj = hproj + params["b_proj"][None, :, None]
    return (xf + hproj).reshape(B, C, H, W).astype(x.dtype)


if __name__ == "__main__":
    # Shapes consistent with the module: channels divisible by 32 (GroupNorm32)
    # and by num_heads; head channels a multiple of 8.
    B, C, H, W = 2, 64, 8, 8          # T = 64 -> padded to 128 lanes inside
    num_heads, num_groups = 2, 32

    key = jax.random.PRNGKey(0)
    kx, k1, k2, k3, k4, k5, k6 = jax.random.split(key, 7)
    x = jax.random.normal(kx, (B, C, H, W), dtype=jnp.float32)
    params = {
        "gn_w": 1.0 + 0.1 * jax.random.normal(k1, (C,), jnp.float32),
        "gn_b": 0.1 * jax.random.normal(k2, (C,), jnp.float32),
        "w_qkv": 0.05 * jax.random.normal(k3, (3 * C, C), jnp.float32),
        "b_qkv": 0.01 * jax.random.normal(k4, (3 * C,), jnp.float32),
        # The module uses zero_module(proj_out); a nonzero proj is used in the
        # self-test so the GroupNorm/QKV/attention math is actually exercised.
        "w_proj": 0.05 * jax.random.normal(k5, (C, C), jnp.float32),
        "b_proj": 0.01 * jax.random.normal(k6, (C,), jnp.float32),
    }

    ref = jax.block_until_ready(
        attention_block_reference(x, params, num_heads=num_heads, num_groups=num_groups))

    # Precise path: f32 MXU operands, exact reciprocal.
    out = jax.block_until_ready(
        attention_block(x, params, num_heads=num_heads, num_groups=num_groups))
    assert out.shape == (B, C, H, W)
    err = float(jnp.max(jnp.abs(out - ref)))
    assert jnp.allclose(out, ref, rtol=3e-3, atol=3e-3), err

    # Fast path: bf16 MXU operands (f32 accumulation) + approx reciprocal.
    out_bf16 = jax.block_until_ready(
        attention_block(x, params, num_heads=num_heads, num_groups=num_groups,
                        compute_dtype=jnp.bfloat16))
    err_bf16 = float(jnp.max(jnp.abs(out_bf16 - ref)))
    assert jnp.allclose(out_bf16, ref, rtol=5e-2, atol=5e-2), err_bf16

    # Multi key-tile + multi query-tile exercise of the flash loop
    # (T = 256 -> 2 key tiles of 128 and 2 query tiles of 128, no padding).
    B2, C2, H2, W2 = 1, 32, 16, 16
    x2 = jax.random.normal(jax.random.PRNGKey(1), (B2, C2, H2, W2), jnp.float32)
    kk = jax.random.split(jax.random.PRNGKey(2), 4)
    params2 = {
        "gn_w": jnp.ones((C2,), jnp.float32),
        "gn_b": jnp.zeros((C2,), jnp.float32),
        "w_qkv": 0.05 * jax.random.normal(kk[0], (3 * C2, C2), jnp.float32),
        "b_qkv": 0.01 * jax.random.normal(kk[1], (3 * C2,), jnp.float32),
        "w_proj": 0.05 * jax.random.normal(kk[2], (C2, C2), jnp.float32),
        "b_proj": 0.01 * jax.random.normal(kk[3], (C2,), jnp.float32),
    }
    out2 = jax.block_until_ready(
        attention_block(x2, params2, num_heads=1, num_groups=32,
                        key_tile=128, q_tile=128, t_tile=128))
    ref2 = attention_block_reference(x2, params2, num_heads=1, num_groups=32)
    err2 = float(jnp.max(jnp.abs(out2 - ref2)))
    assert jnp.allclose(out2, ref2, rtol=3e-3, atol=3e-3), err2

    print("KERNEL_OK")
</pallas_src>

<mosaic_0001>
module attributes {stable_mosaic.version = 11 : i64} {
  func.func @_gn_qkv_kernel(%arg0: i32, %arg1: memref<1x64x128xf32, #tpu.memory_space<vmem>>, %arg2: memref<64x64xf32, #tpu.memory_space<vmem>>, %arg3: memref<64x1xf32, #tpu.memory_space<vmem>>, %arg4: memref<64x1xf32, #tpu.memory_space<vmem>>, %arg5: memref<192x64xf32, #tpu.memory_space<vmem>>, %arg6: memref<192x1xf32, #tpu.memory_space<vmem>>, %arg7: memref<1x192x128xf32, #tpu.memory_space<vmem>>) attributes {dimension_semantics = [#tpu.dimension_semantics<parallel>], iteration_bounds = array<i64: 2>, scalar_prefetch = 0 : i64, scratch_operands = 0 : i64, tpu.core_type = #tpu.core_type<tc>, window_params = [{transform_indices = @transform_0, window_bounds = array<i64: 1, 64, 128>}, {pipeline_mode = #tpu.pipeline_mode<synchronous>, transform_indices = @transform_1, window_bounds = array<i64: 64, 64>}, {pipeline_mode = #tpu.pipeline_mode<synchronous>, transform_indices = @transform_2, window_bounds = array<i64: 64, 1>}, {pipeline_mode = #tpu.pipeline_mode<synchronous>, transform_indices = @transform_3, window_bounds = array<i64: 64, 1>}, {pipeline_mode = #tpu.pipeline_mode<synchronous>, transform_indices = @transform_4, window_bounds = array<i64: 192, 64>}, {pipeline_mode = #tpu.pipeline_mode<synchronous>, transform_indices = @transform_5, window_bounds = array<i64: 192, 1>}, {transform_indices = @transform_6, window_bounds = array<i64: 1, 192, 128>}]} {
    %c0 = arith.constant 0 : index
    %c0_0 = arith.constant 0 : index
    %c0_1 = arith.constant 0 : index
    %0 = vector.load %arg1[%c0, %c0_0, %c0_1] : memref<1x64x128xf32, #tpu.memory_space<vmem>>, vector<1x64x128xf32>
    %1 = vector.shape_cast %0 : vector<1x64x128xf32> to vector<64x128xf32>
    %cst = arith.constant dense<0.000000e+00> : vector<64xf32>
    %2 = vector.multi_reduction <add>, %1, %cst [1] : vector<64x128xf32> to vector<64xf32>
    %3 = vector.shape_cast %2 : vector<64xf32> to vector<64x1xf32>
    %c0_2 = arith.constant 0 : index
    %c0_3 = arith.constant 0 : index
    %4 = vector.load %arg2[%c0_2, %c0_3] : memref<64x64xf32, #tpu.memory_space<vmem>>, vector<64x64xf32>
    %cst_4 = arith.constant dense<0.000000e+00> : vector<64x1xf32>
    %5 = tpu.matmul %4, %3, %cst_4 {dimension_numbers = #tpu.dot_dimension_numbers<[1], [0], [0], [1], [0, 0, 1, 1], [], []>, precision = #tpu.contract_precision<fp32>} : vector<64x64xf32>, vector<64x1xf32>, vector<64x1xf32> -> vector<64x1xf32>
    %cst_5 = arith.constant 1.280000e+02 : f32
    %6 = vector.broadcast %cst_5 : f32 to vector<64x1xf32>
    %7 = arith.divf %5, %6 : vector<64x1xf32>
    %8 = vector.broadcast %7 : vector<64x1xf32> to vector<64x128xf32>
    %9 = arith.subf %1, %8 : vector<64x128xf32>
    %10 = arith.mulf %9, %9 : vector<64x128xf32>
    %11 = tpu.iota {dimensions = array<i32: 1>} : vector<1x128xi32>
    %c64_i32 = arith.constant 64 : i32
    %12 = vector.broadcast %c64_i32 : i32 to vector<1x128xi32>
    %13 = arith.cmpi slt, %11, %12 : vector<1x128xi32>
    %cst_6 = arith.constant 0.000000e+00 : f32
    %14 = vector.shape_cast %13 : vector<1x128xi1> to vector<1x128xi1>
    %15 = vector.broadcast %14 : vector<1x128xi1> to vector<64x128xi1>
    %16 = vector.broadcast %cst_6 : f32 to vector<64x128xf32>
    %17 = arith.select %15, %10, %16 : vector<64x128xi1>, vector<64x128xf32>
    %cst_7 = arith.constant dense<0.000000e+00> : vector<64xf32>
    %18 = vector.multi_reduction <add>, %17, %cst_7 [1] : vector<64x128xf32> to vector<64xf32>
    %19 = vector.shape_cast %18 : vector<64xf32> to vector<64x1xf32>
    %c0_8 = arith.constant 0 : index
    %c0_9 = arith.constant 0 : index
    %20 = vector.load %arg2[%c0_8, %c0_9] : memref<64x64xf32, #tpu.memory_space<vmem>>, vector<64x64xf32>
    %cst_10 = arith.constant dense<0.000000e+00> : vector<64x1xf32>
    %21 = tpu.matmul %20, %19, %cst_10 {dimension_numbers = #tpu.dot_dimension_numbers<[1], [0], [0], [1], [0, 0, 1, 1], [], []>, precision = #tpu.contract_precision<fp32>} : vector<64x64xf32>, vector<64x1xf32>, vector<64x1xf32> -> vector<64x1xf32>
    %cst_11 = arith.constant 1.280000e+02 : f32
    %22 = vector.broadcast %cst_11 : f32 to vector<64x1xf32>
    %23 = arith.divf %21, %22 : vector<64x1xf32>
    %cst_12 = arith.constant 9.99999974E-6 : f32
    %24 = vector.broadcast %cst_12 : f32 to vector<64x1xf32>
    %25 = arith.addf %23, %24 : vector<64x1xf32>
    %26 = math.rsqrt %25 : vector<64x1xf32>
    %27 = vector.broadcast %26 : vector<64x1xf32> to vector<64x128xf32>
    %28 = arith.mulf %9, %27 : vector<64x128xf32>
    %c0_13 = arith.constant 0 : index
    %c0_14 = arith.constant 0 : index
    %29 = vector.load %arg3[%c0_13, %c0_14] : memref<64x1xf32, #tpu.memory_space<vmem>>, vector<64x1xf32>
    %30 = vector.broadcast %29 : vector<64x1xf32> to vector<64x128xf32>
    %31 = arith.mulf %28, %30 : vector<64x128xf32>
    %c0_15 = arith.constant 0 : index
    %c0_16 = arith.constant 0 : index
    %32 = vector.load %arg4[%c0_15, %c0_16] : memref<64x1xf32, #tpu.memory_space<vmem>>, vector<64x1xf32>
    %33 = vector.broadcast %32 : vector<64x1xf32> to vector<64x128xf32>
    %34 = arith.addf %31, %33 : vector<64x128xf32>
    %c0_17 = arith.constant 0 : index
    %c0_18 = arith.constant 0 : index
    %35 = vector.load %arg5[%c0_17, %c0_18] : memref<192x64xf32, #tpu.memory_space<vmem>>, vector<192x64xf32>
    %cst_19 = arith.constant dense<0.000000e+00> : vector<192x128xf32>
    %36 = tpu.matmul %35, %34, %cst_19 {dimension_numbers = #tpu.dot_dimension_numbers<[1], [0], [0], [1], [0, 0, 1, 1], [], []>, precision = #tpu.contract_precision<fp32>} : vector<192x64xf32>, vector<64x128xf32>, vector<192x128xf32> -> vector<192x128xf32>
    %c0_20 = arith.constant 0 : index
    %c0_21 = arith.constant 0 : index
    %37 = vector.load %arg6[%c0_20, %c0_21] : memref<192x1xf32, #tpu.memory_space<vmem>>, vector<192x1xf32>
    %38 = vector.broadcast %37 : vector<192x1xf32> to vector<192x128xf32>
    %39 = arith.addf %36, %38 : vector<192x128xf32>
    %c0_22 = arith.constant 0 : index
    %c0_23 = arith.constant 0 : index
    %c0_24 = arith.constant 0 : index
    %40 = vector.load %arg7[%c0_22, %c0_23, %c0_24] : memref<1x192x128xf32, #tpu.memory_space<vmem>>, vector<1x192x128xf32>
    %41 = vector.shape_cast %40 : vector<1x192x128xf32> to vector<192x128xf32>
    %42 = vector.shape_cast %39 : vector<192x128xf32> to vector<1x192x128xf32>
    tpu.vector_store %arg7[%c0_22, %c0_23, %c0_24], %42 {strides = array<i32>} : memref<1x192x128xf32, #tpu.memory_space<vmem>>, vector<1x192x128xf32>,
    return
  }
  func.func @transform_0(%arg0: i32) -> (i32, i32, i32) {
    %c0_i32 = arith.constant 0 : i32
    %c0_i32_0 = arith.constant 0 : i32
    %c0_i32_1 = arith.constant 0 : i32
    return %arg0, %c0_i32, %c0_i32_0 : i32, i32, i32
  }
  func.func @transform_1(%arg0: i32) -> (i32, i32) {
    %c0_i32 = arith.constant 0 : i32
    %c0_i32_0 = arith.constant 0 : i32
    %c0_i32_1 = arith.constant 0 : i32
    return %c0_i32, %c0_i32_0 : i32, i32
  }
  func.func @transform_2(%arg0: i32) -> (i32, i32) {
    %c0_i32 = arith.constant 0 : i32
    %c0_i32_0 = arith.constant 0 : i32
    %c0_i32_1 = arith.constant 0 : i32
    return %c0_i32, %c0_i32_0 : i32, i32
  }
  func.func @transform_3(%arg0: i32) -> (i32, i32) {
    %c0_i32 = arith.constant 0 : i32
    %c0_i32_0 = arith.constant 0 : i32
    %c0_i32_1 = arith.constant 0 : i32
    return %c0_i32, %c0_i32_0 : i32, i32
  }
  func.func @transform_4(%arg0: i32) -> (i32, i32) {
    %c0_i32 = arith.constant 0 : i32
    %c0_i32_0 = arith.constant 0 : i32
    %c0_i32_1 = arith.constant 0 : i32
    return %c0_i32, %c0_i32_0 : i32, i32
  }
  func.func @transform_5(%arg0: i32) -> (i32, i32) {
    %c0_i32 = arith.constant 0 : i32
    %c0_i32_0 = arith.constant 0 : i32
    %c0_i32_1 = arith.constant 0 : i32
    return %c0_i32, %c0_i32_0 : i32, i32
  }
  func.func @transform_6(%arg0: i32) -> (i32, i32, i32) {
    %c0_i32 = arith.constant 0 : i32
    %c0_i32_0 = arith.constant 0 : i32
    %c0_i32_1 = arith.constant 0 : i32
    return %arg0, %c0_i32, %c0_i32_0 : i32, i32, i32
  }
}

</mosaic_0001>

<bundles_post_ra>
// kernel: tpu_custom_call.1
= control target key start
LH: loop header
LB: loop body
LE: loop exit
PB: predicated region body
PF: predicated region fallthrough
CT: control target
= control target key end

     0   :  { %11 = vsyncpa [#allocation3], 0  ;;  %s7164_s0 = inlined_call_operand.vmem [shape: f32[2,64,128], index: 0, kind: input, shape index: {}]   ;;  %s7165_s1 = inlined_call_operand.vmem [shape: f32[64,64], index: 1, kind: input, shape index: {}]   ;;  %s7166_s2 = inlined_call_operand.vmem [shape: f32[64,1], index: 2, kind: input, shape index: {}]   ;;  %s7167_s3 = inlined_call_operand.vmem [shape: f32[64,1], index: 3, kind: input, shape index: {}]   ;;  %s7168_s4 = inlined_call_operand.vmem [shape: f32[192,64], index: 4, kind: input, shape index: {}]   ;;  %s7169_s5 = inlined_call_operand.vmem [shape: f32[192,1], index: 5, kind: input, shape index: {}]   ;;  %s7170_s6 = inlined_call_operand.hbm [shape: f32[2,192,128], index: 6, kind: output, shape index: {}]  }
   0x1   :  { %13 = vsyncpa [#allocation3 + $0x1], 0  ;;  %s5846_s21 = smov 0   ;;  %s5848_s22 = smov 0  }
   0x2   :  { %s5850_s23 = smov 0   ;;  %s5852_s24 = smov 0  }
   0x3 LB: > { %s5867_s25 = sadd.s32 4294967295, %s5805_s24   ;;  %s4127_s26 = sadd.s32 4294967294, %s5805_s24   ;;  %s5805_s24 = sphi %s5852_s24, %s7273_s24   ;;  %s5801_s23 = sphi %s5850_s23, %s7272_s23   ;;  %s5797_s22 = sphi %s5848_s22, %s7271_s22   ;;  %s5793_s21 = sphi %s5846_s21, %s7270_s21  }
   0x4   : > { %s5871_s27 = sadd.s32 1, %s5805_s24   ;;  %s157_s28 = sadd.s32 1, %s5801_s23 }
   0x5   : > { %s154_s29 = ssub.s32 %s5805_s24, %s5871_s27  ;;  %p167_p0 = scmp.ne.s32.totalorder %s5801_s23, %s5797_s22 }
   0x6   : > { %p155_p1 = scmp.eq.s32.totalorder %s154_s29, 0  ;;  %p168_p2 = scmp.eq.s32.totalorder %s5867_s25, 1 }
   0x7   : > { %p173_p3 = scmp.ne.s32.totalorder %s5797_s22, %s5793_s21  ;;  %p174_p4 = scmp.eq.s32.totalorder %s4127_s26, 1 }
   0x8   : > { %s5882_s30 = scalar_select %p155_p1, %s5801_s23, %s157_s28  }
   0x9   : > { %p5884_p5 = por %p168_p2, %p167_p0  ;;  %p5888_p6 = por %p174_p4, %p173_p3 }
   0xa   : > { %p4130_p7 = scmp.ge.s32.totalorder %s5805_s24, 1  ;;  %p215_p8 = scmp.lt.s32.totalorder %s5805_s24, 3 }
   0xc   : > { %p216_p9 = pnand %p4130_p7, %p215_p8 }
   0xe   : > { %219 = sbr.rel (%p216_p9) target bundleno = 1632 (0x660), region = 44 }
  0x15   : > { %p245_p10 = scmp.lt.s32.totalorder %s5867_s25, 1  ;;  %v274_v8 = vld [vmem:[%s7165_s1] sm:$0xff]  ;;  %vm282_vm0 = vcmask 523264   ;;  %v275_v15 = vld [vmem:[%s7165_s1 + $0x8] sm:$0xff]  ;;  %v276_v19 = vld [vmem:[%s7165_s1 + $0x10] sm:$0xff]  ;;  %s242_s29 = sand.u32 1, %s5797_s22  }
  0x16   : > { %v284_v9 = vsel %vm282_vm0, %v274_v8, 0  ;;  %v287_v18 = vsel %vm282_vm0, %v275_v15, 0  ;;  %v277_v20 = vld [vmem:[%s7165_s1 + $0x18] sm:$0xff]  ;;  %v290_v25 = vsel %vm282_vm0, %v276_v19, 0  ;;  %v278_v29 = vld [vmem:[%s7165_s1 + $0x20] sm:$0xff]  ;;  %v279_v34 = vld [vmem:[%s7165_s1 + $0x28] sm:$0xff] }
  0x17   : > { %s246_s9 = scalar_select %p245_p10, %s5867_s25, 1  ;;  %v5927_v10 = vand.u32 4294901760, %v284_v9  ;;  %v5947_v21 = vand.u32 4294901760, %v287_v18  ;;  %v293_v26 = vsel %vm282_vm0, %v277_v20, 0  ;;  %v5957_v32 = vand.u32 4294901760, %v290_v25  ;;  %v280_v43 = vld [vmem:[%s7165_s1 + $0x30] sm:$0xff] }
  0x18   : > { %v5959_v33 = vand.u32 4294901760, %v293_v26  ;;  %v296_v40 = vsel %vm282_vm0, %v278_v29, 0  ;;  %v299_v47 = vsel %vm282_vm0, %v279_v34, 0  ;;  %v281_v48 = vld [vmem:[%s7165_s1 + $0x38] sm:$0xff]  ;;  %v302_v58 = vsel %vm282_vm0, %v280_v43, 0  ;;  %s5682_s11 = smul.u32 3072, %s5867_s25 }
  0x19   : > { %s4136_s10 = sshll.u32 %s246_s9, 6  ;;  %v5930_v11 = vsub.f32 %v284_v9, %v5927_v10  ;;  %v5955_v31 = vsub.f32 %v287_v18, %v5947_v21  ;;  %v5991_v51 = vsub.f32 %v290_v25, %v5957_v32  ;;  %v5993_v52 = vand.u32 4294901760, %v296_v40  ;;  %s5681_s9 = smul.u32 192, %s242_s29 }
  0x1a   : > { %s249_s13 = scalar_lea.vmem %s7164_s0, %s4136_s10  ;;  %v6000_v57 = vsub.f32 %v293_v26, %v5959_v33  ;;  %v6006_v61 = vand.u32 4294901760, %v299_v47  ;;  %v305_v62 = vsel %vm282_vm0, %v281_v48, 0  ;;  %s7117_s15 = scalar_lea.hbm %s7170_s6, %s5682_s11 }
  0x1b   : > { %v5899_v0 = vld [vmem:[%s249_s13 + $0x10] sm:$0xff]  ;;  %v5901_v1 = vld [vmem:[%s249_s13] sm:$0xff]  ;;  %v5905_v2 = vld [vmem:[%s249_s13 + $0x18] sm:$0xff]  ;;  %v5933_v12 = vand.u32 4294901760, %v5930_v11  ;;  %v5988_v50 = vand.u32 4294901760, %v5955_v31  ;;  %v6017_v15 = vand.u32 4294901760, %v5991_v51 }
  0x1c   : > { %262 = vadd.xlane.f32.xlu1 %v5899_v0  ;;  %258 = vadd.xlane.f32.xlu0 %v5901_v1  ;;  %v5907_v3 = vld [vmem:[%s249_s13 + $0x8] sm:$0xff]  ;;  %v5913_v5 = vld [vmem:[%s249_s13 + $0x20] sm:$0xff]  ;;  %v5917_v6 = vld [vmem:[%s249_s13 + $0x38] sm:$0xff]  ;;  %v6040_v25 = vsub.f32 %v299_v47, %v6006_v61  ;;  %v6042_v26 = vand.u32 4294901760, %v305_v62  ;;  %s7084_s10 = scalar_lea.vmem [#allocation2], %s5681_s9  ;;  %s7123_s25 = scalar_lea.sflag [#allocation3], %s242_s29 }
  0x1d   : > { %v5911_v4 = vld [vmem:[%s249_s13 + $0x28] sm:$0xff]  ;;  %v5919_v7 = vld [vmem:[%s249_s13 + $0x30] sm:$0xff]  ;;  %v383_v13 = vsub.f32 %v5930_v11, %v5933_v12  ;;  %v393_v20 = vsub.f32 %v5955_v31, %v5988_v50  ;;  %s4065_s12 = sshll.u32 %s7084_s10, 4  ;;  %s5808_s17 = smov [#allocation2]   ;;  %s7112_s12 = int_to_ptr.vmem [resolvable:$true] %s4065_s12 }
  0x1e   : > { %s5743_s16 = scalar_lea.vmem %s7112_s12, 3072  ;;  %s5747_s18 = sshll.u32 %s5808_s17, 4  ;;  %s5748_s18 = int_to_ptr.vmem [resolvable:$false] %s5747_s18 }
  0x1f   : > { %v384_v14 = vand.u32 4294901760, %v383_v13  ;;  %v6062_v43 = vand.u32 4294901760, %v393_v20  ;;  %p5744_p11 = scmp.ne.s32.totalorder %s7112_s12, %s5743_s16  ;;  %s5749_s19 = scalar_lea.vmem %s5748_s18, 6144 }
  0x20   : > { %264 = vadd.xlane.f32.xlu1 %v5905_v2  ;;  %260 = vadd.xlane.f32.xlu0 %v5907_v3  ;;  %p5750_p0 = scmp.lt.s32.totalorder %s7112_s12, %s5748_s18  ;;  %p5751_p1 = scmp.lt.s32.totalorder %s5749_s19, %s5743_s16 }
  0x21   : > { %4537 = vmatprep.mubr.f32.mxu0 %v384_v14  ;;  %4705 = vmatprep.mubr.f32.mxu1 %v384_v14  ;;  %p5745_p12 = pnand %p5744_p11, %p5884_p5 }
  0x22   : > { %p5752_p2 = por %p5751_p1, %p5750_p0 }
  0x23   : > { %p5746_p13 = pneg %p5745_p12 }
  0x24   : > { %268 = vadd.xlane.f32.xlu1 %v5911_v4  ;;  %266 = vadd.xlane.f32.xlu0 %v5913_v5 }
  0x25   : > { %p5753_p3 = pnand %p5752_p2, %p5746_p13 }
  0x28   : > { %272 = vadd.xlane.f32.xlu1 %v5917_v6  ;;  %270 = vadd.xlane.f32.xlu0 %v5919_v7 }
  0xa9   : > { %v263_v16 = vpop.xlane.xlu1 %262  ;;  %v259_v17 = vpop.xlane.xlu0 %258 }
  0xaa   : > { %v308_v22 = vand.u32 4294901760, %v259_v17  ;;  %v314_v30 = vand.u32 4294901760, %v263_v16 }
  0xac   : > { %v5964_v35 = vsub.f32 %v259_v17, %v308_v22  ;;  %v5984_v49 = vsub.f32 %v263_v16, %v314_v30  ;;  %v6020_v16 = vsub.f32 %v296_v40, %v5993_v52  ;;  %v6022_v17 = vand.u32 4294901760, %v302_v58 }
  0xad   : > { %v265_v23 = vpop.xlane.xlu1 %264  ;;  %v261_v24 = vpop.xlane.xlu0 %260 }
  0xae   : > { %v317_v27 = vand.u32 4294901760, %v265_v23  ;;  %v311_v28 = vand.u32 4294901760, %v261_v24  ;;  %v463_v53 = vand.u32 4294901760, %v5964_v35  ;;  %v7174_v14 = vand.u32 4294901760, %v5984_v49 }
  0xaf   : > { %v6059_v40 = vsub.f32 %v302_v58, %v6022_v17 }
  0xb0   : > { %v5966_v36 = vpack.c.bf16 %v311_v28, %v308_v22  ;;  %v5968_v37 = vsub.f32 %v261_v24, %v311_v28  ;;  %v5971_v41 = vsub.f32 %v265_v23, %v317_v27  ;;  %v5976_v44 = vpack.c.bf16 %v317_v27, %v314_v30 }
  0xb1   : > { %v269_v38 = vpop.xlane.xlu1 %268  ;;  %v267_v39 = vpop.xlane.xlu0 %266  ;;  %v464_v18 = vsub.f32 %v5964_v35, %v463_v53  ;;  %v6033_v22 = vand.u32 4294901760, %v6000_v57  ;;  %v478_v34 = vsub.f32 %v5984_v49, %v7174_v14 }
  0xb2   : > { %v323_v42 = vand.u32 4294901760, %v269_v38  ;;  %v7176_v45 = vand.u32 4294901760, %v5968_v37  ;;  %v320_v46 = vand.u32 4294901760, %v267_v39  ;;  %5170 = vmatprep.subr.bf16.mxu0 %v5966_v36  ;;  %v7172_v59 = vand.u32 4294901760, %v5971_v41 }
  0xb3   : > { %5172 = vmatpush3.bf16.msra.mxu0 %v5966_v36 }
  0xb4   : > { %v5996_v54 = vpack.c.bf16 %v323_v42, %v320_v46  ;;  %5174 = vmatprep.subr.bf16.mxu0 %v5976_v44  ;;  %v6004_v60 = vsub.f32 %v269_v38, %v323_v42  ;;  %v471_v63 = vsub.f32 %v5968_v37, %v7176_v45  ;;  %v6012_v8 = vsub.f32 %v267_v39, %v320_v46 }
  0xb5   : > { %v273_v55 = vpop.xlane.xlu1 %272  ;;  %v271_v56 = vpop.xlane.xlu0 %270  ;;  %v485_v23 = vsub.f32 %v5971_v41, %v7172_v59  ;;  %v403_v38 = vsub.f32 %v5991_v51, %v6017_v15  ;;  %v6056_v39 = vand.u32 4294901760, %v6020_v16  ;;  %v465_v42 = vand.u32 4294901760, %v464_v18 }
  0xb6   : > { %v329_v9 = vand.u32 4294901760, %v273_v55  ;;  %v326_v13 = vand.u32 4294901760, %v271_v56  ;;  %v7171_v24 = vand.u32 4294901760, %v6004_v60  ;;  %v7173_v27 = vand.u32 4294901760, %v6012_v8 }
  0xb7   : > { %5176 = vmatpush3.bf16.msra.mxu0 %v5976_v44  ;;  %v472_v30 = vand.u32 4294901760, %v471_v63  ;;  %v413_v46 = vsub.f32 %v6000_v57, %v6033_v22  ;;  %v486_v48 = vand.u32 4294901760, %v485_v23  ;;  %v479_v18 = vand.u32 4294901760, %v478_v34 }
  0xb8   : > { %v6027_v19 = vpack.c.bf16 %v329_v9, %v326_v13  ;;  %5178 = vmatprep.subr.bf16.mxu0 %v5996_v54  ;;  %v6045_v28 = vsub.f32 %v273_v55, %v329_v9  ;;  %v6047_v29 = vsub.f32 %v271_v56, %v326_v13  ;;  %v499_v47 = vsub.f32 %v6004_v60, %v7171_v24 }
  0xb9   : > { %v6070_v55 = vand.u32 4294901760, %v6040_v25  ;;  %v6073_v56 = vsub.f32 %v305_v62, %v6042_v26  ;;  %v492_v58 = vsub.f32 %v6012_v8, %v7173_v27  ;;  %v5185_v13 = vpack.c.bf16 %v472_v30, %v465_v42 }
  0xba   : > { %v7175_v63 = vand.u32 4294901760, %v6045_v28  ;;  %v7177_v9 = vand.u32 4294901760, %v6047_v29  ;;  %v6081_v20 = vand.u32 4294901760, %v403_v38  ;;  %v423_v23 = vsub.f32 %v6020_v16, %v6056_v39 }
  0xbb   : > { %5180 = vmatpush3.bf16.msra.mxu0 %v5996_v54  ;;  %v6086_v62 = vand.u32 4294901760, %v6059_v40  ;;  %v5189_v24 = vpack.c.bf16 %v486_v48, %v479_v18  ;;  %v6088_v59 = vand.u32 4294901760, %v413_v46  ;;  %v433_v27 = vsub.f32 %v6040_v25, %v6070_v55 }
  0xbc   : > { %5182 = vmatprep.subr.bf16.mxu0 %v6027_v19  ;;  %v6093_v30 = vand.u32 4294901760, %v6073_v56  ;;  %v513_v34 = vsub.f32 %v6045_v28, %v7175_v63  ;;  %v506_v38 = vsub.f32 %v6047_v29, %v7177_v9  ;;  %v493_v42 = vand.u32 4294901760, %v492_v58 }
  0xbd   : > { %v500_v48 = vand.u32 4294901760, %v499_v47  ;;  %v6103_v46 = vand.u32 4294901760, %v423_v23  ;;  %v443_v18 = vsub.f32 %v6059_v40, %v6086_v62  ;;  %v6107_v14 = vand.u32 4294901760, %v433_v27 }
  0xbe   : > { %v507_v45 = vand.u32 4294901760, %v506_v38  ;;  %v514_v9 = vand.u32 4294901760, %v513_v34  ;;  %v453_v58 = vsub.f32 %v6073_v56, %v6093_v30  ;;  %v5201_v27 = vpack.c.bf16 %v5968_v37, %v5964_v35 }
  0xbf   : > { %5184 = vmatpush3.bf16.msra.mxu0 %v6027_v19  ;;  %v5193_v63 = vpack.c.bf16 %v500_v48, %v493_v42  ;;  %v6113_v47 = vand.u32 4294901760, %v443_v18  ;;  %v7211_v38 = vand.u32 4294901760, %v5984_v49  ;;  %v7212_v42 = vand.u32 4294901760, %v5971_v41 }
  0xc0   : > { %5186 = vmatprep.subr.bf16.mxu0 %v5185_v13  ;;  %v6116_v23 = vand.u32 4294901760, %v453_v58  ;;  %v7213_v35 = vand.u32 4294901760, %v6012_v8 }
  0xc1   : > { %v5237_v48 = vpack.c.bf16 %v7212_v42, %v7211_v38  ;;  %v1210_v42 = vlaneseq }
  0xc2   : > { %4538 = vmatmul.mubr.f32.vlgmr.msra.gmra.mrb[0].mxu0 %v6062_v43 }
  0xc3   : > { %5188 = vmatpush3.bf16.msra.mxu0 %v5185_v13  ;;  %4540 = vmatprep.mubr.f32.mxu0 %v6081_v20  ;;  %v5197_v13 = vpack.c.bf16 %v514_v9, %v507_v45  ;;  %v5205_v45 = vpack.c.bf16 %v5971_v41, %v5984_v49  ;;  %v7210_v9 = vand.u32 4294901760, %v5968_v37  ;;  %v7214_v37 = vand.u32 4294901760, %v6004_v60 }
  0xc4   : > { %5190 = vmatprep.subr.bf16.mxu0 %v5189_v24  ;;  %v7215_v41 = vand.u32 4294901760, %v6047_v29  ;;  %v7216_v49 = vand.u32 4294901760, %v6045_v28 }
  0xc5   : > { %v5233_v34 = vpack.c.bf16 %v7210_v9, %v463_v53  ;;  %v5241_v53 = vpack.c.bf16 %v7214_v37, %v7213_v35 }
  0xc6   : > { %4541 = vmatmul.mubr.f32.gmra.mrb[2].mxu0 %v6088_v59  ;;  %v5245_v18 = vpack.c.bf16 %v7216_v49, %v7215_v41 }
  0xc7   : > { %5192 = vmatpush3.bf16.msra.mxu0 %v5189_v24  ;;  %4543 = vmatprep.mubr.f32.mxu0 %v6103_v46  ;;  %v5209_v24 = vpack.c.bf16 %v6004_v60, %v6012_v8 }
  0xc8   : > { %5194 = vmatprep.subr.bf16.mxu0 %v5193_v63 }
  0xca   : > { %4544 = vmatmul.mubr.f32.gmra.mrb[4].mxu0 %v6107_v14 }
  0xcb   : > { %5196 = vmatpush3.bf16.msra.mxu0 %v5193_v63  ;;  %4546 = vmatprep.mubr.f32.mxu0 %v6113_v47  ;;  %v5213_v63 = vpack.c.bf16 %v6045_v28, %v6047_v29 }
  0xcc   : > { %5198 = vmatprep.subr.bf16.mxu0 %v5197_v13 }
  0xce   : > { %4547 = vmatmul.mubr.f32.gmra.mrb[6].mxu0 %v6116_v23 }
  0xcf   : > { %5200 = vmatpush3.bf16.msra.mxu0 %v5197_v13  ;;  %4565 = vmatprep.mubr.f32.mxu0 %v5927_v10 }
  0xd0   : > { %5202 = vmatprep.subr.bf16.mxu0 %v5201_v27 }
  0xd2   : > { %4566 = vmatmul.mubr.f32.vlgmr.msra.gmra.mrb[0].mxu0 %v5947_v21 }
  0xd3   : > { %5204 = vmatpush3.bf16.msra.mxu0 %v5201_v27  ;;  %4568 = vmatprep.mubr.f32.mxu0 %v5957_v32 }
  0xd4   : > { %5206 = vmatprep.subr.bf16.mxu0 %v5205_v45 }
  0xd6   : > { %4569 = vmatmul.mubr.f32.gmra.mrb[2].mxu0 %v5959_v33 }
  0xd7   : > { %5208 = vmatpush3.bf16.msra.mxu0 %v5205_v45  ;;  %4571 = vmatprep.mubr.f32.mxu0 %v5993_v52 }
  0xd8   : > { %5210 = vmatprep.subr.bf16.mxu0 %v5209_v24 }
  0xda   : > { %4572 = vmatmul.mubr.f32.gmra.mrb[4].mxu0 %v6006_v61 }
  0xdb   : > { %5212 = vmatpush3.bf16.msra.mxu0 %v5209_v24  ;;  %4574 = vmatprep.mubr.f32.mxu0 %v6022_v17 }
  0xdc   : > { %5214 = vmatprep.subr.bf16.mxu0 %v5213_v63 }
  0xde   : > { %4575 = vmatmul.mubr.f32.gmra.mrb[6].mxu0 %v6042_v26 }
  0xdf   : > { %5216 = vmatpush3.bf16.msra.mxu0 %v5213_v63  ;;  %4593 = vmatprep.mubr.f32.mxu0 %v5930_v11 }
  0xe0   : > { %5218 = vmatprep.subr.bf16.mxu0 %v5966_v36 }
  0xe2   : > { %4594 = vmatmul.mubr.f32.vlgmr.msra.gmra.mrb[0].mxu0 %v5955_v31 }
  0xe3   : > { %5220 = vmatpush3.bf16.msra.mxu0 %v5966_v36  ;;  %4596 = vmatprep.mubr.f32.mxu0 %v5991_v51 }
  0xe4   : > { %5222 = vmatprep.subr.bf16.mxu0 %v5976_v44 }
  0xe6   : > { %4597 = vmatmul.mubr.f32.gmra.mrb[2].mxu0 %v6000_v57 }
  0xe7   : > { %5224 = vmatpush3.bf16.msra.mxu0 %v5976_v44  ;;  %4599 = vmatprep.mubr.f32.mxu0 %v6020_v16 }
  0xe8   : > { %5226 = vmatprep.subr.bf16.mxu0 %v5996_v54 }
  0xea   : > { %4600 = vmatmul.mubr.f32.gmra.mrb[4].mxu0 %v6040_v25 }
  0xeb   : > { %5228 = vmatpush3.bf16.msra.mxu0 %v5996_v54  ;;  %4602 = vmatprep.mubr.f32.mxu0 %v6059_v40 }
  0xec   : > { %5230 = vmatprep.subr.bf16.mxu0 %v6027_v19 }
  0xee   : > { %4603 = vmatmul.mubr.f32.gmra.mrb[6].mxu0 %v6073_v56 }
  0xef   : > { %5232 = vmatpush3.bf16.msra.mxu0 %v6027_v19  ;;  %4621 = vmatprep.mubr.f32.mxu0 %v5933_v12 }
  0xf0   : > { %5234 = vmatprep.subr.bf16.mxu0 %v5233_v34 }
  0xf2   : > { %4622 = vmatmul.mubr.f32.vlgmr.msra.gmra.mrb[0].mxu0 %v5988_v50 }
  0xf3   : > { %5236 = vmatpush3.bf16.msra.mxu0 %v5233_v34  ;;  %4624 = vmatprep.mubr.f32.mxu0 %v6017_v15 }
  0xf4   : > { %5238 = vmatprep.subr.bf16.mxu0 %v5237_v48 }
  0xf6   : > { %4625 = vmatmul.mubr.f32.gmra.mrb[2].mxu0 %v6033_v22 }
  0xf7   : > { %5240 = vmatpush3.bf16.msra.mxu0 %v5237_v48  ;;  %4627 = vmatprep.mubr.f32.mxu0 %v6056_v39  ;;  %v1211_v48 = vand.u32 127, %v1210_v42 }
  0xf8   : > { %5242 = vmatprep.subr.bf16.mxu0 %v5241_v53 }
  0xf9   : > { %vm1212_vm1 = vcmp.lt.s32.totalorder %v1211_v48, 64  ;;  %v2206_v48 = vld [vmem:[%s7167_s3 + $0x8] sm:$0xff] }
  0xfa   : > { %4628 = vmatmul.mubr.f32.gmra.mrb[4].mxu0 %v6070_v55 }
  0xfb   : > { %5244 = vmatpush3.bf16.msra.mxu0 %v5241_v53  ;;  %4630 = vmatprep.mubr.f32.mxu0 %v6086_v62 }
  0xfc   : > { %5246 = vmatprep.subr.bf16.mxu0 %v5245_v18 }
  0xfe   : > { %4631 = vmatmul.mubr.f32.gmra.mrb[6].mxu0 %v6093_v30 }
  0xff   : > { %5248 = vmatpush3.bf16.msra.mxu0 %v5245_v18  ;;  %4649 = vmatprep.mubr.f32.mxu0 %v5927_v10 }
 0x100   : > { %5250 = vmatprep.subr.bf16.mxu0 %v5966_v36 }
 0x102   : > { %4650 = vmatmul.mubr.f32.vlgmr.msra.gmra.mrb[0].mxu0 %v5947_v21 }
 0x103   : > { %5252 = vmatpush3.bf16.msra.mxu0 %v5966_v36  ;;  %4652 = vmatprep.mubr.f32.mxu0 %v5957_v32  ;;  %v5807_v36 = vmov 0  }
 0x104   : > { %5254 = vmatprep.subr.bf16.mxu0 %v5976_v44  ;;  %5726 = vset.pattern.permute.xlu1 %v5807_v36 }
 0x105   : > { %5725 = vset.pattern.permute.xlu0 %v5807_v36 }
 0x106   : > { %4653 = vmatmul.mubr.f32.gmra.mrb[2].mxu0 %v5959_v33 }
 0x107   : > { %5256 = vmatpush3.bf16.msra.mxu0 %v5976_v44  ;;  %4655 = vmatprep.mubr.f32.mxu0 %v5993_v52 }
 0x108   : > { %5258 = vmatprep.subr.bf16.mxu0 %v5996_v54 }
 0x10a   : > { %4656 = vmatmul.mubr.f32.gmra.mrb[4].mxu0 %v6006_v61 }
 0x10b   : > { %5260 = vmatpush3.bf16.msra.mxu0 %v5996_v54  ;;  %4658 = vmatprep.mubr.f32.mxu0 %v6022_v17 }
 0x10c   : > { %5262 = vmatprep.subr.bf16.mxu0 %v6027_v19 }
 0x10e   : > { %4659 = vmatmul.mubr.f32.gmra.mrb[6].mxu0 %v6042_v26 }
 0x10f   : > { %5264 = vmatpush3.bf16.msra.mxu0 %v6027_v19  ;;  %4677 = vmatprep.mubr.f32.mxu0 %v5927_v10 }
 0x112   : > { %4678 = vmatmul.mubr.f32.vlgmr.msra.gmra.mrb[0].mxu0 %v5947_v21 }
 0x113   : > { %4680 = vmatprep.mubr.f32.mxu0 %v5957_v32 }
 0x116   : > { %4681 = vmatmul.mubr.f32.gmra.mrb[2].mxu0 %v5959_v33 }
 0x117   : > { %4683 = vmatprep.mubr.f32.mxu0 %v5993_v52 }
 0x11a   : > { %4684 = vmatmul.mubr.f32.gmra.mrb[4].mxu0 %v6006_v61 }
 0x11b   : > { %4686 = vmatprep.mubr.f32.mxu0 %v6022_v17 }
 0x11e   : > { %4687 = vmatmul.mubr.f32.gmra.mrb[6].mxu0 %v6042_v26 }
 0x1e5   : > { %v4679_v44 = vpop.f32.mrb[0].mxu0 }
 0x1e6   : > { %v1147_v54 = vmul.f32 0.0078125, %v4679_v44  ;;  %v1099_v60 = vpop.f32.mrb[1].mxu0 }
 0x1e7   : > { %v1146_v8 = vmul.f32 0.0078125, %v1099_v60 }
 0x1e8   : > { %1161 = vperm.xlu1 %5726, %v1147_v54  }
 0x1e9   : > { %1156 = vperm.xlu0 %5725, %v1146_v8   ;;  %v4682_v19 = vpop.f32.mrb[2].mxu0 }
 0x1ea   : > { %v1149_v28 = vmul.f32 0.0078125, %v4682_v19  ;;  %v1111_v29 = vpop.f32.mrb[3].mxu0 }
 0x1eb   : > { %v1148_v13 = vmul.f32 0.0078125, %v1111_v29 }
 0x1ec   : > { %1171 = vperm.xlu1 %5726, %v1149_v28  }
 0x1ed   : > { %v4685_v58 = vpop.f32.mrb[4].mxu0 }
 0x1ee   : > { %v1123_v27 = vpop.f32.mrb[5].mxu0  ;;  %v1151_v24 = vmul.f32 0.0078125, %v4685_v58 }
 0x1ef   : > { %v1150_v9 = vmul.f32 0.0078125, %v1123_v27 }
 0x1f0   : > { %1166 = vperm.xlu1 %5726, %v1148_v13  }
 0x1f1   : > { %v4688_v45 = vpop.f32.mrb[6].mxu0 }
 0x1f2   : > { %v1135_v63 = vpop.f32.mrb[7].mxu0  ;;  %v1153_v38 = vmul.f32 0.0078125, %v4688_v45 }
 0x1f3   : > { %v1152_v34 = vmul.f32 0.0078125, %v1135_v63 }
 0x1f4   : > { %1181 = vperm.xlu1 %5726, %v1151_v24  }
 0x1f8   : > { %1176 = vperm.xlu1 %5726, %v1150_v9  }
 0x1fc   : > { %1186 = vperm.xlu1 %5726, %v1152_v34  }
 0x200   : > { %1191 = vperm.xlu1 %5726, %v1153_v38  }
 0x267   : > { %v1162_v35 = vpop.permute.xlu1 %1161 }
 0x268   : > { %v6201_v37 = vsub.f32 %v5907_v3, %v1162_v35  ;;  %v1157_v53 = vpop.permute.xlu0 %1156 }
 0x269   : > { %v6204_v41 = vsub.f32 %v5901_v1, %v1157_v53 }
 0x26a   : > { %v1203_v49 = vmul.f32 %v6201_v37, %v6201_v37 }
 0x26b   : > { %v1172_v18 = vpop.permute.xlu1 %1171  ;;  %v1202_v36 = vmul.f32 %v6204_v41, %v6204_v41 }
 0x26c   : > { %v6211_v44 = vsub.f32 %v5905_v2, %v1172_v18  ;;  %v1216_v54 = vsel %vm1212_vm1, %v1203_v49, 0.0  ;;  %v2150_v49 = vld [vmem:[%s7166_s2 + $0x8] sm:$0xff]  ;;  %v2151_v18 = vld [vmem:[%s7166_s2 + $0x10] sm:$0xff] }
 0x26d   : > { %1225 = vadd.xlane.f32.xlu0 %v1216_v54  ;;  %v1215_v3 = vsel %vm1212_vm1, %v1202_v36, 0.0  ;;  %v2152_v36 = vld [vmem:[%s7166_s2 + $0x18] sm:$0xff]  ;;  %v2207_v54 = vld [vmem:[%s7167_s3 + $0x10] sm:$0xff] }
 0x26e   : > { %1223 = vadd.xlane.f32.xlu1 %v1215_v3  ;;  %v1205_v1 = vmul.f32 %v6211_v44, %v6211_v44  ;;  %v2208_v3 = vld [vmem:[%s7167_s3 + $0x18] sm:$0xff] }
 0x26f   : > { %v1167_v60 = vpop.permute.xlu1 %1166 }
 0x270   : > { %v6218_v8 = vsub.f32 %v5899_v0, %v1167_v60  ;;  %v1218_v19 = vsel %vm1212_vm1, %v1205_v1, 0.0  ;;  %v2153_v1 = vld [vmem:[%s7166_s2 + $0x20] sm:$0xff]  ;;  %v2154_v60 = vld [vmem:[%s7166_s2 + $0x28] sm:$0xff] }
 0x272   : > { %1229 = vadd.xlane.f32.xlu1 %v1218_v19  ;;  %v1204_v2 = vmul.f32 %v6218_v8, %v6218_v8  ;;  %v2209_v19 = vld [vmem:[%s7167_s3 + $0x20] sm:$0xff] }
 0x273   : > { %v1182_v28 = vpop.permute.xlu1 %1181 }
 0x274   : > { %v6224_v29 = vsub.f32 %v5911_v4, %v1182_v28  ;;  %v1217_v58 = vsel %vm1212_vm1, %v1204_v2, 0.0  ;;  %v2210_v2 = vld [vmem:[%s7167_s3 + $0x28] sm:$0xff]  ;;  %v2155_v28 = vld [vmem:[%s7166_s2 + $0x30] sm:$0xff] }
 0x275   : > { %1227 = vadd.xlane.f32.xlu0 %v1217_v58  ;;  %v2156_v58 = vld [vmem:[%s7166_s2 + $0x38] sm:$0xff] }
 0x276   : > { %v1207_v13 = vmul.f32 %v6224_v29, %v6224_v29 }
 0x277   : > { %v1177_v27 = vpop.permute.xlu1 %1176 }
 0x278   : > { %v6230_v0 = vsub.f32 %v5913_v5, %v1177_v27  ;;  %v1220_v45 = vsel %vm1212_vm1, %v1207_v13, 0.0 }
 0x279   : > { %1233 = vadd.xlane.f32.xlu1 %v1220_v45 }
 0x27a   : > { %v1206_v24 = vmul.f32 %v6230_v0, %v6230_v0 }
 0x27b   : > { %v1187_v63 = vpop.permute.xlu1 %1186 }
 0x27c   : > { %v6236_v4 = vsub.f32 %v5919_v7, %v1187_v63  ;;  %v1219_v9 = vsel %vm1212_vm1, %v1206_v24, 0.0  ;;  %v2149_v7 = vld [vmem:[%s7166_s2] sm:$0xff] }
 0x27d   : > { %1231 = vadd.xlane.f32.xlu0 %v1219_v9 }
 0x27e   : > { %7217 = vst [vmem:[#allocation5_spill] sm:$0xff] %v6236_v4  ;;  %v1208_v34 = vmul.f32 %v6236_v4, %v6236_v4 }
 0x27f   : > { %v1192_v38 = vpop.permute.xlu1 %1191 }
 0x280   : > { %v6242_v5 = vsub.f32 %v5917_v6, %v1192_v38  ;;  %v1221_v42 = vsel %vm1212_vm1, %v1208_v34, 0.0  ;;  %v2205_v6 = vld [vmem:[%s7167_s3] sm:$0xff] }
 0x281   : > { %1235 = vadd.xlane.f32.xlu0 %v1221_v42 }
 0x282   : > { %7218 = vst [vmem:[#allocation6_spill] sm:$0xff] %v6242_v5  ;;  %v1209_v35 = vmul.f32 %v6242_v5, %v6242_v5 }
 0x284   : > { %v1222_v53 = vsel %vm1212_vm1, %v1209_v35, 0.0 }
 0x285   : > { %1237 = vadd.xlane.f32.xlu1 %v1222_v53 }
 0x296   : > { %2159 = vperm.xlu1 %5726, %v2149_v7  }
 0x297   : > { %2164 = vperm.xlu0 %5725, %v2150_v49  }
 0x29a   : > { %2215 = vperm.xlu1 %5726, %v2205_v6  }
 0x29b   : > { %2220 = vperm.xlu0 %5725, %v2206_v48  }
 0x29e   : > { %2169 = vperm.xlu1 %5726, %v2151_v18  }
 0x29f   : > { %2174 = vperm.xlu0 %5725, %v2152_v36  }
 0x2a2   : > { %2225 = vperm.xlu1 %5726, %v2207_v54  }
 0x2a3   : > { %2230 = vperm.xlu0 %5725, %v2208_v3  }
 0x2a6   : > { %2179 = vperm.xlu1 %5726, %v2153_v1  }
 0x2a7   : > { %2184 = vperm.xlu0 %5725, %v2154_v60  }
 0x2aa   : > { %2235 = vperm.xlu1 %5726, %v2209_v19  }
 0x2ab   : > { %2240 = vperm.xlu0 %5725, %v2210_v2  }
 0x2ae   : > { %2189 = vperm.xlu1 %5726, %v2155_v28  }
 0x2af   : > { %2194 = vperm.xlu0 %5725, %v2156_v58  }
 0x2fa   : > { %v1226_v13 = vpop.xlane.xlu0 %1225 }
 0x2fb   : > { %v1243_v27 = vand.u32 4294901760, %v1226_v13  ;;  %v1224_v45 = vpop.xlane.xlu1 %1223 }
 0x2fc   : > { %v1240_v24 = vand.u32 4294901760, %v1224_v45 }
 0x2fd   : > { %v6296_v53 = vsub.f32 %v1226_v13, %v1243_v27 }
 0x2fe   : > { %v6290_v63 = vpack.c.bf16 %v1243_v27, %v1240_v24  ;;  %v6298_v7 = vsub.f32 %v1224_v45, %v1240_v24 }
 0x2ff   : > { %v1230_v9 = vpop.xlane.xlu1 %1229  ;;  %v7178_v6 = vand.u32 4294901760, %v6296_v53 }
 0x300   : > { %5266 = vmatprep.subr.bf16.mxu1 %v6290_v63  ;;  %v1249_v38 = vand.u32 4294901760, %v1230_v9  ;;  %v7179_v18 = vand.u32 4294901760, %v6298_v7 }
 0x301   : > { %5268 = vmatpush3.bf16.msra.mxu1 %v6290_v63  ;;  %v1403_v19 = vsub.f32 %v6296_v53, %v7178_v6 }
 0x302   : > { %v1228_v34 = vpop.xlane.xlu0 %1227  ;;  %v6306_v1 = vsub.f32 %v1230_v9, %v1249_v38  ;;  %v1396_v28 = vsub.f32 %v6298_v7, %v7179_v18 }
 0x303   : > { %v1246_v42 = vand.u32 4294901760, %v1228_v34 }
 0x304   : > { %v7184_v27 = vand.u32 4294901760, %v6306_v1 }
 0x305   : > { %v6294_v35 = vpack.c.bf16 %v1249_v38, %v1246_v42  ;;  %v6304_v36 = vsub.f32 %v1228_v34, %v1246_v42  ;;  %v1404_v34 = vand.u32 4294901760, %v1403_v19 }
 0x306   : > { %v1234_v49 = vpop.xlane.xlu1 %1233 }
 0x307   : > { %5270 = vmatprep.subr.bf16.mxu1 %v6294_v35  ;;  %v1255_v54 = vand.u32 4294901760, %v1234_v49  ;;  %v7181_v58 = vand.u32 4294901760, %v6304_v36 }
 0x308   : > { %5272 = vmatpush3.bf16.msra.mxu1 %v6294_v35 }
 0x309   : > { %v6322_v45 = vsub.f32 %v1234_v49, %v1255_v54  ;;  %v1410_v38 = vsub.f32 %v6304_v36, %v7181_v58 }
 0x30a   : > { %v1232_v48 = vpop.xlane.xlu0 %1231 }
 0x30b   : > { %v1252_v3 = vand.u32 4294901760, %v1232_v48  ;;  %v1430_v18 = vand.u32 4294901760, %v6322_v45  ;;  %v1411_v5 = vand.u32 4294901760, %v1410_v38 }
 0x30d   : > { %v6308_v60 = vpack.c.bf16 %v1255_v54, %v1252_v3  ;;  %v6317_v13 = vsub.f32 %v1232_v48, %v1252_v3  ;;  %v1397_v48 = vand.u32 4294901760, %v1396_v28  ;;  %v1417_v3 = vsub.f32 %v6306_v1, %v7184_v27 }
 0x30e   : > { %v1236_v2 = vpop.xlane.xlu0 %1235 }
 0x30f   : > { %5274 = vmatprep.subr.bf16.mxu1 %v6308_v60  ;;  %v1258_v24 = vand.u32 4294901760, %v1236_v2  ;;  %v7183_v42 = vand.u32 4294901760, %v6317_v13  ;;  %v5281_v28 = vpack.c.bf16 %v1404_v34, %v1397_v48 }
 0x310   : > { %5276 = vmatpush3.bf16.msra.mxu1 %v6308_v60 }
 0x311   : > { %v6332_v4 = vsub.f32 %v1236_v2, %v1258_v24  ;;  %v1424_v19 = vsub.f32 %v6317_v13, %v7183_v42  ;;  %v1431_v2 = vsub.f32 %v6322_v45, %v1430_v18 }
 0x312   : > { %v1238_v9 = vpop.xlane.xlu1 %1237 }
 0x313   : > { %v1261_v6 = vand.u32 4294901760, %v1238_v9  ;;  %v1425_v27 = vand.u32 4294901760, %v1424_v19  ;;  %v1432_v38 = vand.u32 4294901760, %v1431_v2  ;;  %v2211_v19 = vld [vmem:[%s7167_s3 + $0x30] sm:$0xff] }
 0x315   : > { %v6334_v49 = vpack.c.bf16 %v1261_v6, %v1258_v24  ;;  %v6336_v54 = vsub.f32 %v1238_v9, %v1261_v6  ;;  %v1437_v24 = vand.u32 4294901760, %v6332_v4  ;;  %v1418_v6 = vand.u32 4294901760, %v1417_v3 }
 0x316   : > { %v5289_v48 = vpack.c.bf16 %v1432_v38, %v1425_v27  ;;  %v2288_v38 = vld [vmem:[%s7169_s5 + $0x18] sm:$0xff] }
 0x317   : > { %v1444_v58 = vand.u32 4294901760, %v6336_v54  ;;  %5278 = vmatprep.subr.bf16.mxu1 %v6334_v49  ;;  %v5285_v42 = vpack.c.bf16 %v1418_v6, %v1411_v5  ;;  %v1438_v34 = vsub.f32 %v6332_v4, %v1437_v24  ;;  %v2285_v6 = vld [vmem:[%s7169_s5] sm:$0xff] }
 0x318   : > { %5280 = vmatpush3.bf16.msra.mxu1 %v6334_v49 }
 0x319   : > { %5282 = vmatprep.subr.bf16.mxu1 %v5281_v28  ;;  %v1445_v9 = vsub.f32 %v6336_v54, %v1444_v58 }
 0x31b   : > { %4706 = vmatmul.mubr.f32.vlgmr.msra.gmra.mrb[0].mxu1 %v6062_v43  ;;  %v1446_v3 = vand.u32 4294901760, %v1445_v9  ;;  %v1439_v43 = vand.u32 4294901760, %v1438_v34 }
 0x31c   : > { %5284 = vmatpush3.bf16.msra.mxu1 %v5281_v28  ;;  %4708 = vmatprep.mubr.f32.mxu1 %v6081_v20  ;;  %v5297_v20 = vpack.c.bf16 %v6296_v53, %v6298_v7  ;;  %v2261_v28 = vld [vmem:[%s7168_s4] sm:$0xff] }
 0x31d   : > { %5286 = vmatprep.subr.bf16.mxu1 %v5285_v42  ;;  %v5293_v5 = vpack.c.bf16 %v1446_v3, %v1439_v43  ;;  %v2430_v2 = vsel %vm282_vm0, %v2261_v28, 0  ;;  %v2266_v28 = vld [vmem:[%s7168_s4 + $0x28] sm:$0xff] }
 0x31e   : > { %v6457_v9 = vand.u32 4294901760, %v2430_v2 }
 0x31f   : > { %4709 = vmatmul.mubr.f32.gmra.mrb[2].mxu1 %v6088_v59  ;;  %v5301_v59 = vpack.c.bf16 %v6306_v1, %v6304_v36 }
 0x320   : > { %5288 = vmatpush3.bf16.msra.mxu1 %v5285_v42  ;;  %4711 = vmatprep.mubr.f32.mxu1 %v6103_v46  ;;  %v5309_v46 = vpack.c.bf16 %v6336_v54, %v6332_v4  ;;  %v2212_v54 = vld [vmem:[%s7167_s3 + $0x38] sm:$0xff]  ;;  %v6460_v34 = vsub.f32 %v2430_v2, %v6457_v9 }
 0x321   : > { %5290 = vmatprep.subr.bf16.mxu1 %v5289_v48 }
 0x322   : > { %v2576_v3 = vand.u32 4294901760, %v6460_v34 }
 0x323   : > { %4712 = vmatmul.mubr.f32.gmra.mrb[4].mxu1 %v6107_v14  ;;  %v5305_v14 = vpack.c.bf16 %v6322_v45, %v6317_v13 }
 0x324   : > { %5292 = vmatpush3.bf16.msra.mxu1 %v5289_v48  ;;  %4714 = vmatprep.mubr.f32.mxu1 %v6113_v47  ;;  %v2287_v48 = vld [vmem:[%s7169_s5 + $0x10] sm:$0xff]  ;;  %v2577_v43 = vsub.f32 %v6460_v34, %v2576_v3 }
 0x325   : > { %5294 = vmatprep.subr.bf16.mxu1 %v5293_v5  ;;  %5029 = vmatprep.mubr.f32.mxu0 %v2576_v3 }
 0x327   : > { %4715 = vmatmul.mubr.f32.gmra.mrb[6].mxu1 %v6116_v23 }
 0x328   : > { %5296 = vmatpush3.bf16.msra.mxu1 %v5293_v5  ;;  %4733 = vmatprep.mubr.f32.mxu1 %v5927_v10  ;;  %v2290_v5 = vld [vmem:[%s7169_s5 + $0x28] sm:$0xff] }
 0x329   : > { %5298 = vmatprep.subr.bf16.mxu1 %v5297_v20 }
 0x32b   : > { %4734 = vmatmul.mubr.f32.vlgmr.msra.gmra.mrb[0].mxu1 %v5947_v21 }
 0x32c   : > { %5300 = vmatpush3.bf16.msra.mxu1 %v5297_v20  ;;  %4736 = vmatprep.mubr.f32.mxu1 %v5957_v32  ;;  %v2289_v20 = vld [vmem:[%s7169_s5 + $0x20] sm:$0xff] }
 0x32d   : > { %5302 = vmatprep.subr.bf16.mxu1 %v5301_v59 }
 0x32f   : > { %4737 = vmatmul.mubr.f32.gmra.mrb[2].mxu1 %v5959_v33 }
 0x330   : > { %5304 = vmatpush3.bf16.msra.mxu1 %v5301_v59  ;;  %4739 = vmatprep.mubr.f32.mxu1 %v5993_v52  ;;  %v2578_v59 = vand.u32 4294901760, %v2577_v43 }
 0x331   : > { %5306 = vmatprep.subr.bf16.mxu1 %v5305_v14 }
 0x333   : > { %4740 = vmatmul.mubr.f32.gmra.mrb[4].mxu1 %v6006_v61 }
 0x334   : > { %5308 = vmatpush3.bf16.msra.mxu1 %v5305_v14  ;;  %4742 = vmatprep.mubr.f32.mxu1 %v6022_v17  ;;  %v2292_v14 = vld [vmem:[%s7169_s5 + $0x38] sm:$0xff] }
 0x335   : > { %5310 = vmatprep.subr.bf16.mxu1 %v5309_v46 }
 0x337   : > { %4743 = vmatmul.mubr.f32.gmra.mrb[6].mxu1 %v6042_v26 }
 0x338   : > { %5312 = vmatpush3.bf16.msra.mxu1 %v5309_v46  ;;  %4761 = vmatprep.mubr.f32.mxu1 %v5930_v11  ;;  %v7219_v11 = vand.u32 4294901760, %v6298_v7  ;;  %v2291_v46 = vld [vmem:[%s7169_s5 + $0x30] sm:$0xff] }
 0x339   : > { %5314 = vmatprep.subr.bf16.mxu1 %v6290_v63 }
 0x33b   : > { %4762 = vmatmul.mubr.f32.vlgmr.msra.gmra.mrb[0].mxu1 %v5955_v31  ;;  %v7220_v31 = vand.u32 4294901760, %v6296_v53 }
 0x33c   : > { %5316 = vmatpush3.bf16.msra.mxu1 %v6290_v63  ;;  %4764 = vmatprep.mubr.f32.mxu1 %v5991_v51 }
 0x33d   : > { %5318 = vmatprep.subr.bf16.mxu1 %v6294_v35  ;;  %v5329_v51 = vpack.c.bf16 %v7220_v31, %v7219_v11  ;;  %v2294_v11 = vld [vmem:[%s7169_s5 + $0x48] sm:$0xff]  ;;  %v2293_v31 = vld [vmem:[%s7169_s5 + $0x40] sm:$0xff] }
 0x33f   : > { %4765 = vmatmul.mubr.f32.gmra.mrb[2].mxu1 %v6000_v57  ;;  %v7221_v57 = vand.u32 4294901760, %v6304_v36 }
 0x340   : > { %5320 = vmatpush3.bf16.msra.mxu1 %v6294_v35  ;;  %4767 = vmatprep.mubr.f32.mxu1 %v6020_v16  ;;  %v7222_v16 = vand.u32 4294901760, %v6306_v1 }
 0x341   : > { %5322 = vmatprep.subr.bf16.mxu1 %v6308_v60 }
 0x343   : > { %4768 = vmatmul.mubr.f32.gmra.mrb[4].mxu1 %v6040_v25  ;;  %v5333_v25 = vpack.c.bf16 %v7222_v16, %v7221_v57  ;;  %v2295_v57 = vld [vmem:[%s7169_s5 + $0x50] sm:$0xff]  ;;  %v2298_v16 = vld [vmem:[%s7169_s5 + $0x68] sm:$0xff] }
 0x344   : > { %5324 = vmatpush3.bf16.msra.mxu1 %v6308_v60  ;;  %4770 = vmatprep.mubr.f32.mxu1 %v6059_v40  ;;  %v7223_v40 = vand.u32 4294901760, %v6317_v13 }
 0x345   : > { %5326 = vmatprep.subr.bf16.mxu1 %v6334_v49 }
 0x347   : > { %4771 = vmatmul.mubr.f32.gmra.mrb[6].mxu1 %v6073_v56  ;;  %v5337_v56 = vpack.c.bf16 %v1430_v18, %v7223_v40  ;;  %v2300_v40 = vld [vmem:[%s7169_s5 + $0x78] sm:$0xff] }
 0x348   : > { %5328 = vmatpush3.bf16.msra.mxu1 %v6334_v49  ;;  %4789 = vmatprep.mubr.f32.mxu1 %v5933_v12  ;;  %v5341_v12 = vpack.c.bf16 %v1444_v58, %v1437_v24  ;;  %v2286_v24 = vld [vmem:[%s7169_s5 + $0x8] sm:$0xff] }
 0x349   : > { %5330 = vmatprep.subr.bf16.mxu1 %v5329_v51 }
 0x34b   : > { %4790 = vmatmul.mubr.f32.vlgmr.msra.gmra.mrb[0].mxu1 %v5988_v50 }
 0x34c   : > { %5332 = vmatpush3.bf16.msra.mxu1 %v5329_v51  ;;  %4792 = vmatprep.mubr.f32.mxu1 %v6017_v15  ;;  %v2296_v51 = vld [vmem:[%s7169_s5 + $0x58] sm:$0xff] }
 0x34d   : > { %5334 = vmatprep.subr.bf16.mxu1 %v5333_v25 }
 0x34f   : > { %4793 = vmatmul.mubr.f32.gmra.mrb[2].mxu1 %v6033_v22 }
 0x350   : > { %5336 = vmatpush3.bf16.msra.mxu1 %v5333_v25  ;;  %4795 = vmatprep.mubr.f32.mxu1 %v6056_v39  ;;  %v2297_v25 = vld [vmem:[%s7169_s5 + $0x60] sm:$0xff] }
 0x351   : > { %5338 = vmatprep.subr.bf16.mxu1 %v5337_v56 }
 0x353   : > { %4796 = vmatmul.mubr.f32.gmra.mrb[4].mxu1 %v6070_v55 }
 0x354   : > { %5340 = vmatpush3.bf16.msra.mxu1 %v5337_v56  ;;  %4798 = vmatprep.mubr.f32.mxu1 %v6086_v62  ;;  %v2299_v56 = vld [vmem:[%s7169_s5 + $0x70] sm:$0xff] }
 0x355   : > { %5342 = vmatprep.subr.bf16.mxu1 %v5341_v12 }
 0x357   : > { %4799 = vmatmul.mubr.f32.gmra.mrb[6].mxu1 %v6093_v30 }
 0x358   : > { %5344 = vmatpush3.bf16.msra.mxu1 %v5341_v12  ;;  %4817 = vmatprep.mubr.f32.mxu1 %v5927_v10  ;;  %v2302_v12 = vld [vmem:[%s7169_s5 + $0x88] sm:$0xff] }
 0x359   : > { %5346 = vmatprep.subr.bf16.mxu1 %v6290_v63 }
 0x35b   : > { %4818 = vmatmul.mubr.f32.vlgmr.msra.gmra.mrb[0].mxu1 %v5947_v21 }
 0x35c   : > { %5348 = vmatpush3.bf16.msra.mxu1 %v6290_v63  ;;  %4820 = vmatprep.mubr.f32.mxu1 %v5957_v32 }
 0x35d   : > { %5350 = vmatprep.subr.bf16.mxu1 %v6294_v35 }
 0x35f   : > { %4821 = vmatmul.mubr.f32.gmra.mrb[2].mxu1 %v5959_v33 }
 0x360   : > { %5352 = vmatpush3.bf16.msra.mxu1 %v6294_v35  ;;  %4823 = vmatprep.mubr.f32.mxu1 %v5993_v52 }
 0x361   : > { %5354 = vmatprep.subr.bf16.mxu1 %v6308_v60 }
 0x363   : > { %4824 = vmatmul.mubr.f32.gmra.mrb[4].mxu1 %v6006_v61 }
 0x364   : > { %5356 = vmatpush3.bf16.msra.mxu1 %v6308_v60  ;;  %4826 = vmatprep.mubr.f32.mxu1 %v6022_v17 }
 0x365   : > { %5358 = vmatprep.subr.bf16.mxu1 %v6334_v49 }
 0x367   : > { %4827 = vmatmul.mubr.f32.gmra.mrb[6].mxu1 %v6042_v26 }
 0x368   : > { %5360 = vmatpush3.bf16.msra.mxu1 %v6334_v49  ;;  %4845 = vmatprep.mubr.f32.mxu1 %v5927_v10 }
 0x36b   : > { %4846 = vmatmul.mubr.f32.vlgmr.msra.gmra.mrb[0].mxu1 %v5947_v21 }
 0x36c   : > { %4848 = vmatprep.mubr.f32.mxu1 %v5957_v32 }
 0x36f   : > { %4849 = vmatmul.mubr.f32.gmra.mrb[2].mxu1 %v5959_v33 }
 0x370   : > { %4851 = vmatprep.mubr.f32.mxu1 %v5993_v52 }
 0x373   : > { %4852 = vmatmul.mubr.f32.gmra.mrb[4].mxu1 %v6006_v61 }
 0x374   : > { %4854 = vmatprep.mubr.f32.mxu1 %v6022_v17 }
 0x377   : > { %4855 = vmatmul.mubr.f32.gmra.mrb[6].mxu1 %v6042_v26 }
 0x378   : > { %4873 = vmatprep.mubr.f32.mxu1 %v2578_v59 }
 0x43e   : > { %v4847_v50 = vpop.f32.mrb[0].mxu1 }
 0x43f   : > { %v2078_v15 = vmul.f32 0.0078125, %v4847_v50  ;;  %v2031_v22 = vpop.f32.mrb[1].mxu1  ;;  %v2301_v50 = vld [vmem:[%s7169_s5 + $0x80] sm:$0xff] }
 0x440   : > { %v2077_v39 = vmul.f32 0.0078125, %v2031_v22  ;;  %v2303_v22 = vld [vmem:[%s7169_s5 + $0x90] sm:$0xff] }
 0x441   : > { %v2086_v55 = vadd.f32 1e-05, %v2078_v15  ;;  %v2304_v15 = vld [vmem:[%s7169_s5 + $0x98] sm:$0xff] }
 0x442   : > { %v2085_v10 = vadd.f32 1e-05, %v2077_v39  ;;  %v4850_v62 = vpop.f32.mrb[2].mxu1  ;;  %v2306_v39 = vld [vmem:[%s7169_s5 + $0xa8] sm:$0xff] }
 0x443   : > { %5727 = vrsqrt.f32 %v2086_v55  ;;  %v2080_v21 = vmul.f32 0.0078125, %v4850_v62  ;;  %v2043_v32 = vpop.f32.mrb[3].mxu1  ;;  %v2305_v55 = vld [vmem:[%s7169_s5 + $0xa0] sm:$0xff]  ;;  %v2307_v62 = vld [vmem:[%s7169_s5 + $0xb0] sm:$0xff] }
 0x444   : > { %5729 = vrsqrt.f32 %v2085_v10  ;;  %v2079_v33 = vmul.f32 0.0078125, %v2043_v32  ;;  %v2308_v10 = vld [vmem:[%s7169_s5 + $0xb8] sm:$0xff]  ;;  %v2165_v32 = vpop.permute.xlu0 %2164 }
 0x445   : > { %v2088_v30 = vadd.f32 1e-05, %v2080_v21  ;;  %v2160_v21 = vpop.permute.xlu1 %2159 }
 0x446   : > { %v2087_v52 = vadd.f32 1e-05, %v2079_v33  ;;  %v4853_v47 = vpop.f32.mrb[4].mxu1 }
 0x447   : > { %5731 = vrsqrt.f32 %v2088_v30  ;;  %v2082_v61 = vmul.f32 0.0078125, %v4853_v47  ;;  %v2055_v17 = vpop.f32.mrb[5].mxu1 }
 0x448   : > { %5733 = vrsqrt.f32 %v2087_v52  ;;  %v2081_v26 = vmul.f32 0.0078125, %v2055_v17  ;;  %v2221_v30 = vpop.permute.xlu0 %2220 }
 0x449   : > { %v2090_v23 = vadd.f32 1e-05, %v2082_v61  ;;  %v2216_v33 = vpop.permute.xlu1 %2215 }
 0x44a   : > { %v2089_v4 = vadd.f32 1e-05, %v2081_v26  ;;  %v4856_v63 = vpop.f32.mrb[6].mxu1 }
 0x44b   : > { %5735 = vrsqrt.f32 %v2090_v23  ;;  %v2084_v35 = vmul.f32 0.0078125, %v4856_v63  ;;  %v2067_v53 = vpop.f32.mrb[7].mxu1  ;;  %v2263_v63 = vld [vmem:[%s7168_s4 + $0x10] sm:$0xff] }
 0x44c   : > { %5737 = vrsqrt.f32 %v2089_v4  ;;  %v2083_v7 = vmul.f32 0.0078125, %v2067_v53  ;;  %v2175_v47 = vpop.permute.xlu0 %2174  ;;  %v2262_v4 = vld [vmem:[%s7168_s4 + $0x8] sm:$0xff]  ;;  %v2264_v53 = vld [vmem:[%s7168_s4 + $0x18] sm:$0xff] }
 0x44d   : > { %v5728_v18 = vpop.eup %5727  ;;  %v2092_v36 = vadd.f32 1e-05, %v2084_v35  ;;  %v2170_v52 = vpop.permute.xlu1 %2169  ;;  %v2433_v35 = vsel %vm282_vm0, %v2262_v4, 0 }
 0x44e   : > { %v5730_v1 = vpop.eup %5729  ;;  %v2091_v60 = vadd.f32 1e-05, %v2083_v7  ;;  %2108 = vperm.xlu1 %5726, %v5728_v18   ;;  %v2436_v18 = vsel %vm282_vm0, %v2263_v63, 0 }
 0x44f   : > { %5739 = vrsqrt.f32 %v2092_v36  ;;  %2103 = vperm.xlu0 %5725, %v5730_v1   ;;  %v6551_v1 = vand.u32 4294901760, %v2433_v35 }
 0x450   : > { %5741 = vrsqrt.f32 %v2091_v60  ;;  %v2231_v17 = vpop.permute.xlu0 %2230  ;;  %v2439_v60 = vsel %vm282_vm0, %v2264_v53, 0 }
 0x451   : > { %v5732_v58 = vpop.eup %5731  ;;  %v6530_v61 = vpop.permute.xlu1 %2225 }
 0x452   : > { %v5734_v13 = vpop.eup %5733 }
 0x453   : > { %2118 = vperm.xlu0 %5725, %v5732_v58   ;;  %2113 = vperm.xlu1 %5726, %v5734_v13   ;;  %v6554_v58 = vand.u32 4294901760, %v2436_v18  ;;  %v6557_v13 = vsub.f32 %v2433_v35, %v6551_v1 }
 0x454   : > { %v6534_v23 = vpop.permute.xlu0 %2184 }
 0x455   : > { %v5736_v27 = vpop.eup %5735  ;;  %v6532_v26 = vpop.permute.xlu1 %2179  ;;  %v2586_v2 = vand.u32 4294901760, %v6557_v13 }
 0x456   : > { %v5738_v45 = vpop.eup %5737 }
 0x457   : > { %2128 = vperm.xlu0 %5725, %v5736_v27   ;;  %2123 = vperm.xlu1 %5726, %v5738_v45   ;;  %v6559_v27 = vand.u32 4294901760, %v2439_v60  ;;  %v2265_v45 = vld [vmem:[%s7168_s4 + $0x20] sm:$0xff] }
 0x458   : > { %v6549_v36 = vpop.permute.xlu0 %2240 }
 0x459   : > { %v5740_v42 = vpop.eup %5739  ;;  %v6546_v7 = vpop.permute.xlu1 %2235 }
 0x45a   : > { %v5742_v49 = vpop.eup %5741 }
 0x45b   : > { %2138 = vperm.xlu0 %5725, %v5740_v42   ;;  %2133 = vperm.xlu1 %5726, %v5742_v49  }
 0x45c   : > { %v6566_v49 = vpop.permute.xlu0 %2194 }
 0x45d   : > { %v6564_v42 = vpop.permute.xlu1 %2189 }
 0x45f   : > { %2250 = vperm.xlu0 %5725, %v2212_v54   ;;  %2245 = vperm.xlu1 %5726, %v2211_v19   ;;  %v6569_v54 = vsub.f32 %v2436_v18, %v6554_v58  ;;  %v2442_v19 = vsel %vm282_vm0, %v2265_v45, 0 }
 0x460   : > { %v6581_v43 = vand.u32 4294901760, %v2442_v19 }
 0x461   : > { %7224 = vst [vmem:[#allocation7_spill] sm:$0xff] %v6569_v54  ;;  %v7190_v3 = vand.u32 4294901760, %v6569_v54 }
 0x463   : > { %2316 = vperm.xlu0 %5725, %v2286_v24   ;;  %2311 = vperm.xlu1 %5726, %v2285_v6   ;;  %v6577_v24 = vsub.f32 %v2439_v60, %v6559_v27 }
 0x467   : > { %2326 = vperm.xlu0 %5725, %v2288_v38   ;;  %2321 = vperm.xlu1 %5726, %v2287_v48  }
 0x46b   : > { %2336 = vperm.xlu0 %5725, %v2290_v5   ;;  %2331 = vperm.xlu1 %5726, %v2289_v20   ;;  %v2445_v5 = vsel %vm282_vm0, %v2266_v28, 0 }
 0x46f   : > { %2346 = vperm.xlu0 %5725, %v2292_v14   ;;  %2341 = vperm.xlu1 %5726, %v2291_v46   ;;  %v6588_v14 = vsub.f32 %v6557_v13, %v2586_v2  ;;  %v7186_v46 = vand.u32 4294901760, %v6577_v24 }
 0x473   : > { %2356 = vperm.xlu0 %5725, %v2294_v11   ;;  %2351 = vperm.xlu1 %5726, %v2293_v31   ;;  %v6594_v31 = vand.u32 4294901760, %v2445_v5 }
 0x477   : > { %2366 = vperm.xlu0 %5725, %v2296_v51   ;;  %2361 = vperm.xlu1 %5726, %v2295_v57  }
 0x47b   : > { %2376 = vperm.xlu0 %5725, %v2298_v16   ;;  %2371 = vperm.xlu1 %5726, %v2297_v25   ;;  %v6602_v25 = vsub.f32 %v2442_v19, %v6581_v43 }
 0x47d   : > { %v7185_v4 = vand.u32 4294901760, %v6602_v25 }
 0x47f   : > { %2386 = vperm.xlu0 %5725, %v2300_v40   ;;  %2381 = vperm.xlu1 %5726, %v2299_v56  }
 0x483   : > { %2396 = vperm.xlu0 %5725, %v2302_v12   ;;  %2391 = vperm.xlu1 %5726, %v2301_v50  }
 0x487   : > { %2406 = vperm.xlu0 %5725, %v2304_v15   ;;  %2401 = vperm.xlu1 %5726, %v2303_v22   ;;  %v2588_v22 = vand.u32 4294901760, %v6588_v14 }
 0x48b   : > { %2416 = vperm.xlu0 %5725, %v2306_v39   ;;  %2411 = vperm.xlu1 %5726, %v2305_v55   ;;  %v6613_v39 = vsub.f32 %v6577_v24, %v7186_v46  ;;  %v2273_v46 = vld [vmem:[%s7168_s4 + $0x60] sm:$0xff] }
 0x48f   : > { %2426 = vperm.xlu0 %5725, %v2308_v10   ;;  %2421 = vperm.xlu1 %5726, %v2307_v62  }
 0x4cd   : > { %v2109_v6 = vpop.permute.xlu1 %2108 }
 0x4ce   : > { %v2142_v38 = vmul.f32 %v2109_v6, %v6201_v37  ;;  %v2104_v48 = vpop.permute.xlu0 %2103  ;;  %v2267_v37 = vld [vmem:[%s7168_s4 + $0x30] sm:$0xff] }
 0x4cf   : > { %v2141_v20 = vmul.f32 %v2104_v48, %v6204_v41  ;;  %v6599_v41 = vsub.f32 %v6569_v54, %v7190_v3  ;;  %v6607_v50 = vsel %vm282_vm0, %v2267_v37, 0 }
 0x4d0   : > { %v2198_v59 = vmul.f32 %v2165_v32, %v2142_v38  ;;  %v6626_v63 = vand.u32 4294901760, %v6607_v50 }
 0x4d1   : > { %v2197_v11 = vmul.f32 %v2160_v21, %v2141_v20  ;;  %v6616_v21 = vsub.f32 %v2445_v5, %v6594_v31 }
 0x4d2   : > { %v2254_v51 = vadd.f32 %v2221_v30, %v2198_v59  ;;  %v2119_v57 = vpop.permute.xlu0 %2118  ;;  %v2114_v16 = vpop.permute.xlu1 %2113 }
 0x4d3   : > { %v2253_v40 = vadd.f32 %v2216_v33, %v2197_v11  ;;  %v2144_v56 = vmul.f32 %v2119_v57, %v6211_v44  ;;  %v2143_v12 = vmul.f32 %v2114_v16, %v6218_v8  ;;  %7225 = vst [vmem:[#allocation8_spill] sm:$0xff] %v6616_v21  ;;  %v2268_v44 = vld [vmem:[%s7168_s4 + $0x38] sm:$0xff]  ;;  %v7189_v20 = vand.u32 4294901760, %v6616_v21 }
 0x4d4   : > { %v2505_v15 = vand.u32 4294901760, %v2254_v51  ;;  %v2451_v19 = vsel %vm282_vm0, %v2268_v44, 0 }
 0x4d5   : > { %v2502_v55 = vand.u32 4294901760, %v2253_v40  ;;  %v2200_v10 = vmul.f32 %v2175_v47, %v2144_v56  ;;  %v2199_v62 = vmul.f32 %v2170_v52, %v2143_v12  ;;  %v6662_v12 = vand.u32 4294901760, %v2451_v19 }
 0x4d6   : > { %v6621_v8 = vsub.f32 %v2254_v51, %v2505_v15  ;;  %v2129_v32 = vpop.permute.xlu0 %2128  ;;  %v2124_v33 = vpop.permute.xlu1 %2123  ;;  %v2269_v51 = vld [vmem:[%s7168_s4 + $0x40] sm:$0xff] }
 0x4d7   : > { %v6628_v47 = vpack.c.bf16 %v2505_v15, %v2502_v55  ;;  %v6630_v52 = vsub.f32 %v2253_v40, %v2502_v55  ;;  %v2256_v35 = vadd.f32 %v2231_v17, %v2200_v10  ;;  %v2255_v53 = vadd.f32 %v6530_v61, %v2199_v62  ;;  %v7227_v40 = vld [vmem:[#allocation5_spill] sm:$0xff]  ;;  %v2270_v15 = vld [vmem:[%s7168_s4 + $0x48] sm:$0xff] }
 0x4d8   : > { %v2146_v18 = vmul.f32 %v2129_v32, %v6224_v29  ;;  %v2145_v60 = vmul.f32 %v2124_v33, %v6230_v0  ;;  %v2824_v45 = vand.u32 4294901760, %v6621_v8  ;;  %v6677_v10 = vsub.f32 %v6602_v25, %v7185_v4 }
 0x4d9   : > { %v2511_v28 = vand.u32 4294901760, %v2256_v35  ;;  %v2508_v6 = vand.u32 4294901760, %v2255_v53  ;;  %5362 = vmatprep.subr.bf16.mxu1 %v6628_v47  ;;  %5410 = vmatprep.subr.bf16.mxu0 %v6628_v47  ;;  %v2817_v38 = vand.u32 4294901760, %v6630_v52  ;;  %v2466_v17 = vsel %vm282_vm0, %v2273_v46, 0 }
 0x4da   : > { %v2202_v61 = vmul.f32 %v6534_v23, %v2146_v18  ;;  %v2201_v29 = vmul.f32 %v6532_v26, %v2145_v60  ;;  %v2139_v48 = vpop.permute.xlu0 %2138  ;;  %5364 = vmatpush3.bf16.msra.mxu1 %v6628_v47  ;;  %5412 = vmatpush3.bf16.msra.mxu0 %v6628_v47  ;;  %v2134_v0 = vpop.permute.xlu1 %2133  ;;  %v2825_v5 = vsub.f32 %v6621_v8, %v2824_v45  ;;  %v7226_v23 = vld [vmem:[#allocation6_spill] sm:$0xff]  ;;  %v2618_v14 = vand.u32 4294901760, %v6677_v10 }
 0x4db   : > { %v6649_v59 = vsub.f32 %v2256_v35, %v2511_v28  ;;  %v6651_v37 = vpack.c.bf16 %v2511_v28, %v2508_v6  ;;  %v6653_v11 = vsub.f32 %v2255_v53, %v2508_v6  ;;  %v2148_v26 = vmul.f32 %v2139_v48, %v7226_v23 }
 0x4dc   : > { %v2258_v57 = vadd.f32 %v6549_v36, %v2202_v61  ;;  %v2257_v16 = vadd.f32 %v6546_v7, %v2201_v29  ;;  %v2147_v56 = vmul.f32 %v2134_v0, %v7227_v40  ;;  %v2818_v36 = vsub.f32 %v6630_v52, %v2817_v38 }
 0x4dd   : > { %5366 = vmatprep.subr.bf16.mxu1 %v6651_v37  ;;  %5414 = vmatprep.subr.bf16.mxu0 %v6651_v37  ;;  %v2204_v55 = vmul.f32 %v6566_v49, %v2148_v26  ;;  %v2831_v7 = vand.u32 4294901760, %v6653_v11  ;;  %v2454_v35 = vsel %vm282_vm0, %v2269_v51, 0  ;;  %v2826_v18 = vand.u32 4294901760, %v2825_v5  ;;  %v2271_v5 = vld [vmem:[%s7168_s4 + $0x50] sm:$0xff]  ;;  %v2272_v51 = vld [vmem:[%s7168_s4 + $0x58] sm:$0xff] }
 0x4de   : > { %v2517_v62 = vand.u32 4294901760, %v2258_v57  ;;  %v2514_v44 = vand.u32 4294901760, %v2257_v16  ;;  %v2251_v32 = vpop.permute.xlu0 %2250  ;;  %5368 = vmatpush3.bf16.msra.mxu1 %v6651_v37  ;;  %5416 = vmatpush3.bf16.msra.mxu0 %v6651_v37  ;;  %v2203_v49 = vmul.f32 %v6564_v42, %v2147_v56  ;;  %v2246_v33 = vpop.permute.xlu1 %2245  ;;  %v2838_v60 = vand.u32 4294901760, %v6649_v59 }
 0x4df   : > { %v2260_v53 = vadd.f32 %v2251_v32, %v2204_v55  ;;  %v2457_v28 = vsel %vm282_vm0, %v2270_v15, 0  ;;  %v2819_v23 = vand.u32 4294901760, %v2818_v36  ;;  %v2832_v42 = vsub.f32 %v6653_v11, %v2831_v7 }
 0x4e0   : > { %v6685_v6 = vsub.f32 %v2258_v57, %v2517_v62  ;;  %v6687_v61 = vpack.c.bf16 %v2517_v62, %v2514_v44  ;;  %v6689_v29 = vsub.f32 %v2257_v16, %v2514_v44  ;;  %v2259_v48 = vadd.f32 %v2246_v33, %v2203_v49 }
 0x4e1   : > { %v2523_v0 = vand.u32 4294901760, %v2260_v53  ;;  %v2839_v26 = vsub.f32 %v6649_v59, %v2838_v60  ;;  %v6707_v56 = vsub.f32 %v6607_v50, %v6626_v63  ;;  %v6714_v55 = vsub.f32 %v2451_v19, %v6662_v12 }
 0x4e2   : > { %v2520_v57 = vand.u32 4294901760, %v2259_v48  ;;  %5370 = vmatprep.subr.bf16.mxu1 %v6687_v61  ;;  %5418 = vmatprep.subr.bf16.mxu0 %v6687_v61  ;;  %v7188_v16 = vand.u32 4294901760, %v6689_v29  ;;  %v7187_v40 = vand.u32 4294901760, %v6685_v6  ;;  %v6716_v36 = vand.u32 4294901760, %v2454_v35 }
 0x4e3   : > { %7228 = vst [vmem:[#allocation6_spill] sm:$0xff] %v6707_v56  ;;  %v6709_v15 = vsub.f32 %v2260_v53, %v2523_v0  ;;  %5372 = vmatpush3.bf16.msra.mxu1 %v6687_v61  ;;  %5420 = vmatpush3.bf16.msra.mxu0 %v6687_v61  ;;  %7229 = vst [vmem:[#allocation5_spill] sm:$0xff] %v6714_v55  ;;  %v6718_v62 = vand.u32 4294901760, %v2457_v28  ;;  %v2460_v50 = vsel %vm282_vm0, %v2271_v5, 0  ;;  %v2463_v49 = vsel %vm282_vm0, %v2272_v51, 0 }
 0x4e4   : > { %v6720_v44 = vpack.c.bf16 %v2523_v0, %v2520_v57  ;;  %v6722_v32 = vsub.f32 %v2259_v48, %v2520_v57  ;;  %v5377_v33 = vpack.c.bf16 %v2826_v18, %v2819_v23  ;;  %v5425_v53 = vpack.c.bf16 %v2824_v45, %v2817_v38  ;;  %v2274_v38 = vld [vmem:[%s7168_s4 + $0x68] sm:$0xff]  ;;  %v2275_v23 = vld [vmem:[%s7168_s4 + $0x70] sm:$0xff] }
 0x4e5   : > { %v2833_v19 = vand.u32 4294901760, %v2832_v42  ;;  %v2840_v4 = vand.u32 4294901760, %v2839_v26  ;;  %v7192_v0 = vand.u32 4294901760, %v6709_v15  ;;  %v2846_v18 = vsub.f32 %v6689_v29, %v7188_v16 }
 0x4e6   : > { %v7193_v48 = vand.u32 4294901760, %v6722_v32  ;;  %5374 = vmatprep.subr.bf16.mxu1 %v6720_v44  ;;  %5422 = vmatprep.subr.bf16.mxu0 %v6720_v44  ;;  %v2853_v45 = vsub.f32 %v6685_v6, %v7187_v40  ;;  %v6754_v42 = vsub.f32 %v6616_v21, %v7189_v20  ;;  %v7191_v26 = vand.u32 4294901760, %v6707_v56 }
 0x4e7   : > { %5376 = vmatpush3.bf16.msra.mxu1 %v6720_v44  ;;  %5424 = vmatpush3.bf16.msra.mxu0 %v6720_v44  ;;  %v6758_v51 = vand.u32 4294901760, %v2460_v50  ;;  %v6761_v57 = vsub.f32 %v2454_v35, %v6716_v36  ;;  %v6764_v40 = vsub.f32 %v2457_v28, %v6718_v62  ;;  %v6766_v16 = vand.u32 4294901760, %v2463_v49 }
 0x4e8   : > { %5378 = vmatprep.subr.bf16.mxu1 %v5377_v33  ;;  %5426 = vmatprep.subr.bf16.mxu0 %v5425_v53  ;;  %v5381_v20 = vpack.c.bf16 %v2840_v4, %v2833_v19  ;;  %v5429_v3 = vpack.c.bf16 %v2838_v60, %v2831_v7  ;;  %v2469_v30 = vsel %vm282_vm0, %v2274_v38, 0  ;;  %v2472_v5 = vsel %vm282_vm0, %v2275_v23, 0  ;;  %v2276_v7 = vld [vmem:[%s7168_s4 + $0x78] sm:$0xff] }
 0x4e9   : > { %7230 = vst [vmem:[#allocation9_spill] sm:$0xff] %v6761_v57  ;;  %7231 = vst [vmem:[#allocation10_spill] sm:$0xff] %v6764_v40  ;;  %v2847_v35 = vand.u32 4294901760, %v2846_v18  ;;  %v2854_v28 = vand.u32 4294901760, %v2853_v45  ;;  %v2860_v46 = vsub.f32 %v6722_v32, %v7193_v48  ;;  %v2867_v4 = vsub.f32 %v6709_v15, %v7192_v0 }
 0x4ea   : > { %4874 = vmatmul.mubr.f32.vlgmr.msra.gmra.mrb[8].mxu1 %v2588_v22  ;;  %5030 = vmatmul.mubr.f32.vlgmr.msra.gmra.mrb[8].mxu0 %v2586_v2  ;;  %v2628_v2 = vand.u32 4294901760, %v6754_v42  ;;  %v6789_v22 = vsub.f32 %v2460_v50, %v6758_v51  ;;  %v6791_v60 = vand.u32 4294901760, %v2466_v17  ;;  %v2637_v19 = vsub.f32 %v6707_v56, %v7191_v26  ;;  %v2277_v50 = vld [vmem:[%s7168_s4 + $0x80] sm:$0xff] }
 0x4eb   : > { %5380 = vmatpush3.bf16.msra.mxu1 %v5377_v33  ;;  %5428 = vmatpush3.bf16.msra.mxu0 %v5425_v53  ;;  %v7233_v18 = vand.u32 4294901760, %v6714_v55  ;;  %v7234_v45 = vand.u32 4294901760, %v6599_v41  ;;  %v7235_v38 = vand.u32 4294901760, %v6569_v54  ;;  %v6809_v23 = vsub.f32 %v2463_v49, %v6766_v16 }
 0x4ec   : > { %7232 = vst [vmem:[#allocation11_spill] sm:$0xff] %v6789_v22  ;;  %5382 = vmatprep.subr.bf16.mxu1 %v5381_v20  ;;  %5430 = vmatprep.subr.bf16.mxu0 %v5429_v3  ;;  %v6811_v42 = vand.u32 4294901760, %v2469_v30  ;;  %v2475_v26 = vsel %vm282_vm0, %v2276_v7, 0  ;;  %v7237_v0 = vand.u32 4294901760, %v6613_v39  ;;  %v7238_v48 = vand.u32 4294901760, %v6577_v24 }
 0x4ed   : > { %v2647_v33 = vsub.f32 %v6714_v55, %v7233_v18  ;;  %4876 = vmatprep.mubr.f32.mxu1 %v7234_v45  ;;  %5032 = vmatprep.mubr.f32.mxu0 %v7235_v38  ;;  %7236 = vst [vmem:[#allocation12_spill] sm:$0xff] %v6809_v23  ;;  %v6813_v18 = vand.u32 4294901760, %v2472_v5  ;;  %v5385_v41 = vpack.c.bf16 %v2854_v28, %v2847_v35  ;;  %v7239_v45 = vand.u32 4294901760, %v6689_v29 }
 0x4ee   : > { %4877 = vmatmul.mubr.f32.gmra.mrb[10].mxu1 %v7237_v0  ;;  %5033 = vmatmul.mubr.f32.gmra.mrb[10].mxu0 %v7238_v48  ;;  %v7240_v38 = vand.u32 4294901760, %v6685_v6  ;;  %v2861_v49 = vand.u32 4294901760, %v2860_v46  ;;  %v2868_v53 = vand.u32 4294901760, %v2867_v4  ;;  %v7195_v54 = vand.u32 4294901760, %v6789_v22 }
 0x4ef   : > { %5384 = vmatpush3.bf16.msra.mxu1 %v5381_v20  ;;  %5432 = vmatpush3.bf16.msra.mxu0 %v5429_v3  ;;  %v6826_v7 = vsub.f32 %v2466_v17, %v6791_v60  ;;  %v2478_v39 = vsel %vm282_vm0, %v2277_v50, 0  ;;  %v2638_v0 = vand.u32 4294901760, %v2637_v19  ;;  %v2648_v48 = vand.u32 4294901760, %v2647_v33  ;;  %v2278_v20 = vld [vmem:[%s7168_s4 + $0x88] sm:$0xff]  ;;  %v2279_v50 = vld [vmem:[%s7168_s4 + $0x90] sm:$0xff] }
 0x4f0   : > { %v5433_v10 = vpack.c.bf16 %v7240_v38, %v7239_v45  ;;  %5386 = vmatprep.subr.bf16.mxu1 %v5385_v41  ;;  %v7242_v35 = vand.u32 4294901760, %v6761_v57  ;;  %4879 = vmatprep.mubr.f32.mxu1 %v2618_v14  ;;  %v7243_v3 = vand.u32 4294901760, %v6602_v25  ;;  %v7244_v17 = vand.u32 4294901760, %v6764_v40 }
 0x4f1   : > { %7241 = vst [vmem:[#allocation13_spill] sm:$0xff] %v6826_v7  ;;  %v6841_v4 = vsub.f32 %v2469_v30, %v6811_v42  ;;  %v6844_v19 = vsub.f32 %v2472_v5, %v6813_v18  ;;  %v6846_v33 = vand.u32 4294901760, %v2475_v26  ;;  %v7247_v14 = vand.u32 4294901760, %v6616_v21 }
 0x4f2   : > { %5434 = vmatprep.subr.bf16.mxu0 %v5433_v10  ;;  %v2657_v28 = vsub.f32 %v6761_v57, %v7242_v35  ;;  %5035 = vmatprep.mubr.f32.mxu0 %v7243_v3  ;;  %v2667_v46 = vsub.f32 %v6764_v40, %v7244_v17  ;;  %v5389_v45 = vpack.c.bf16 %v2868_v53, %v2861_v49  ;;  %v7248_v38 = vand.u32 4294901760, %v6722_v32 }
 0x4f3   : > { %7245 = vst [vmem:[#allocation14_spill] sm:$0xff] %v6841_v4  ;;  %7246 = vst [vmem:[#allocation15_spill] sm:$0xff] %v6844_v19  ;;  %4880 = vmatmul.mubr.f32.gmra.mrb[12].mxu1 %v2628_v2  ;;  %5036 = vmatmul.mubr.f32.gmra.mrb[12].mxu0 %v7247_v14  ;;  %v7249_v35 = vand.u32 4294901760, %v6709_v15  ;;  %v2686_v3 = vand.u32 4294901760, %v6809_v23  ;;  %v6858_v5 = vand.u32 4294901760, %v2478_v39  ;;  %v2677_v17 = vsub.f32 %v6789_v22, %v7195_v54 }
 0x4f4   : > { %5388 = vmatpush3.bf16.msra.mxu1 %v5385_v41  ;;  %5436 = vmatpush3.bf16.msra.mxu0 %v5433_v10  ;;  %v2696_v2 = vand.u32 4294901760, %v6826_v7  ;;  %v2481_v14 = vsel %vm282_vm0, %v2278_v20, 0  ;;  %v2658_v53 = vand.u32 4294901760, %v2657_v28  ;;  %v2484_v49 = vsel %vm282_vm0, %v2279_v50, 0  ;;  %v2281_v28 = vld [vmem:[%s7168_s4 + $0xa0] sm:$0xff] }
 0x4f5   : > { %v5437_v30 = vpack.c.bf16 %v7249_v35, %v7248_v38  ;;  %5390 = vmatprep.subr.bf16.mxu1 %v5389_v45  ;;  %v2280_v38 = vld [vmem:[%s7168_s4 + $0x98] sm:$0xff]  ;;  %4882 = vmatprep.mubr.f32.mxu1 %v2638_v0  ;;  %v7250_v10 = vand.u32 4294901760, %v6707_v56  ;;  %v2668_v41 = vand.u32 4294901760, %v2667_v46  ;;  %v2706_v35 = vand.u32 4294901760, %v6841_v4 }
 0x4f6   : > { %v2716_v54 = vand.u32 4294901760, %v6844_v19  ;;  %v6874_v20 = vsub.f32 %v2475_v26, %v6846_v33  ;;  %v7252_v50 = vand.u32 4294901760, %v6714_v55  ;;  %v6883_v0 = vpack.c.bf16 %v6621_v8, %v6630_v52  ;;  %v2282_v52 = vld [vmem:[%s7168_s4 + $0xa8] sm:$0xff] }
 0x4f7   : > { %5438 = vmatprep.subr.bf16.mxu0 %v5437_v30  ;;  %5038 = vmatprep.mubr.f32.mxu0 %v7250_v10  ;;  %v2687_v46 = vsub.f32 %v6809_v23, %v2686_v3  ;;  %v6887_v10 = vsub.f32 %v2478_v39, %v6858_v5  ;;  %v6889_v56 = vand.u32 4294901760, %v2481_v14  ;;  %v2678_v26 = vand.u32 4294901760, %v2677_v17 }
 0x4f8   : > { %7251 = vst [vmem:[#allocation16_spill] sm:$0xff] %v6874_v20  ;;  %4883 = vmatmul.mubr.f32.gmra.mrb[14].mxu1 %v2648_v48  ;;  %5039 = vmatmul.mubr.f32.gmra.mrb[14].mxu0 %v7252_v50  ;;  %v2697_v21 = vsub.f32 %v6826_v7, %v2696_v2  ;;  %v6892_v48 = vand.u32 4294901760, %v2484_v49  ;;  %v2487_v50 = vsel %vm282_vm0, %v2280_v38, 0  ;;  %v2490_v8 = vsel %vm282_vm0, %v2281_v28, 0  ;;  %v2283_v38 = vld [vmem:[%s7168_s4 + $0xb0] sm:$0xff] }
 0x4f9   : > { %7253 = vst [vmem:[#allocation17_spill] sm:$0xff] %v6887_v10  ;;  %5392 = vmatpush3.bf16.msra.mxu1 %v5389_v45  ;;  %5440 = vmatpush3.bf16.msra.mxu0 %v5437_v30  ;;  %v7254_v39 = vand.u32 4294901760, %v6761_v57  ;;  %v2707_v45 = vsub.f32 %v6841_v4, %v2706_v35  ;;  %v2717_v30 = vsub.f32 %v6844_v19, %v2716_v54  ;;  %v2726_v17 = vand.u32 4294901760, %v6874_v20 }
 0x4fa   : > { %5394 = vmatprep.subr.bf16.mxu1 %v6883_v0  ;;  %5442 = vmatprep.subr.bf16.mxu0 %v6628_v47  ;;  %v7255_v28 = vand.u32 4294901760, %v6764_v40  ;;  %v2688_v7 = vand.u32 4294901760, %v2687_v46  ;;  %v6913_v23 = vsub.f32 %v2481_v14, %v6889_v56  ;;  %v7256_v19 = vand.u32 4294901760, %v6789_v22  ;;  %v2284_v14 = vld [vmem:[%s7168_s4 + $0xb8] sm:$0xff] }
 0x4fb   : > { %4885 = vmatprep.mubr.f32.mxu1 %v2658_v53  ;;  %5041 = vmatprep.mubr.f32.mxu0 %v7254_v39  ;;  %v2736_v53 = vand.u32 4294901760, %v6887_v10  ;;  %v6915_v39 = vand.u32 4294901760, %v2487_v50  ;;  %v2698_v4 = vand.u32 4294901760, %v2697_v21  ;;  %v6920_v57 = vsub.f32 %v2484_v49, %v6892_v48 }
 0x4fc   : > { %4886 = vmatmul.mubr.f32.gmra.mrb[16].mxu1 %v2668_v41  ;;  %5042 = vmatmul.mubr.f32.gmra.mrb[16].mxu0 %v7255_v28  ;;  %v6922_v41 = vand.u32 4294901760, %v2490_v8  ;;  %v2493_v28 = vsel %vm282_vm0, %v2282_v52, 0  ;;  %v2496_v46 = vsel %vm282_vm0, %v2283_v38, 0  ;;  %v2708_v40 = vand.u32 4294901760, %v2707_v45 }
 0x4fd   : > { %4888 = vmatprep.mubr.f32.mxu1 %v2678_v26  ;;  %5044 = vmatprep.mubr.f32.mxu0 %v7256_v19  ;;  %v2718_v55 = vand.u32 4294901760, %v2717_v30  ;;  %v2727_v26 = vsub.f32 %v6874_v20, %v2726_v17  ;;  %v2737_v21 = vsub.f32 %v6887_v10, %v2736_v53  ;;  %v2746_v19 = vand.u32 4294901760, %v6913_v23 }
 0x4fe   : > { %v6933_v49 = vsub.f32 %v2487_v50, %v6915_v39  ;;  %v6935_v52 = vand.u32 4294901760, %v2493_v28  ;;  %v2756_v38 = vand.u32 4294901760, %v6920_v57  ;;  %v6939_v45 = vsub.f32 %v2490_v8, %v6922_v41 }
 0x4ff   : > { %v6941_v30 = vand.u32 4294901760, %v2496_v46  ;;  %v2747_v10 = vsub.f32 %v6913_v23, %v2746_v19 }
 0x500   : > { %4889 = vmatmul.mubr.f32.gmra.mrb[18].mxu1 %v2688_v7  ;;  %5045 = vmatmul.mubr.f32.gmra.mrb[18].mxu0 %v2686_v3  ;;  %v2499_v7 = vsel %vm282_vm0, %v2284_v14, 0  ;;  %v2728_v3 = vand.u32 4294901760, %v2727_v26  ;;  %v2766_v50 = vand.u32 4294901760, %v6933_v49  ;;  %v6947_v20 = vsub.f32 %v2493_v28, %v6935_v52 }
 0x501   : > { %4891 = vmatprep.mubr.f32.mxu1 %v2698_v4  ;;  %5047 = vmatprep.mubr.f32.mxu0 %v2696_v2  ;;  %v6949_v4 = vand.u32 4294901760, %v2499_v7  ;;  %v2738_v2 = vand.u32 4294901760, %v2737_v21  ;;  %v2757_v8 = vsub.f32 %v6920_v57, %v2756_v38  ;;  %v2776_v22 = vand.u32 4294901760, %v6939_v45 }
 0x502   : > { %v6954_v14 = vsub.f32 %v2496_v46, %v6941_v30  ;;  %v2786_v28 = vand.u32 4294901760, %v6947_v20 }
 0x503   : > { %v6959_v26 = vsub.f32 %v2499_v7, %v6949_v4 }
 0x504   : > { %4892 = vmatmul.mubr.f32.gmra.mrb[20].mxu1 %v2708_v40  ;;  %5048 = vmatmul.mubr.f32.gmra.mrb[20].mxu0 %v2706_v35  ;;  %v2748_v40 = vand.u32 4294901760, %v2747_v10  ;;  %v2767_v35 = vsub.f32 %v6933_v49, %v2766_v50  ;;  %v2796_v21 = vand.u32 4294901760, %v6954_v14 }
 0x505   : > { %4894 = vmatprep.mubr.f32.mxu1 %v2718_v55  ;;  %5050 = vmatprep.mubr.f32.mxu0 %v2716_v54  ;;  %v2758_v54 = vand.u32 4294901760, %v2757_v8  ;;  %v2777_v55 = vsub.f32 %v6939_v45, %v2776_v22  ;;  %v2806_v10 = vand.u32 4294901760, %v6959_v26 }
 0x506   : > { %v2768_v46 = vand.u32 4294901760, %v2767_v35  ;;  %v2797_v7 = vsub.f32 %v6954_v14, %v2796_v21 }
 0x508   : > { %4895 = vmatmul.mubr.f32.gmra.mrb[22].mxu1 %v2728_v3  ;;  %5051 = vmatmul.mubr.f32.gmra.mrb[22].mxu0 %v2726_v17  ;;  %v2787_v17 = vsub.f32 %v6947_v20, %v2786_v28  ;;  %v2778_v3 = vand.u32 4294901760, %v2777_v55  ;;  %v2798_v8 = vand.u32 4294901760, %v2797_v7 }
 0x509   : > { %4897 = vmatprep.mubr.f32.mxu1 %v2738_v2  ;;  %5053 = vmatprep.mubr.f32.mxu0 %v2736_v53  ;;  %v2807_v2 = vsub.f32 %v6959_v26, %v2806_v10 }
 0x50a   : > { %v2788_v53 = vand.u32 4294901760, %v2787_v17 }
 0x50c   : > { %4898 = vmatmul.mubr.f32.gmra.mrb[24].mxu1 %v2748_v40  ;;  %5054 = vmatmul.mubr.f32.gmra.mrb[24].mxu0 %v2746_v19  ;;  %v2808_v19 = vand.u32 4294901760, %v2807_v2 }
 0x50d   : > { %4900 = vmatprep.mubr.f32.mxu1 %v2758_v54  ;;  %5056 = vmatprep.mubr.f32.mxu0 %v2756_v38  ;;  %v5397_v38 = vpack.c.bf16 %v6649_v59, %v6653_v11  ;;  %v7257_v59 = vld [vmem:[#allocation7_spill] sm:$0xff]  ;;  %v2317_v11 = vpop.permute.xlu0 %2316 }
 0x510   : > { %4901 = vmatmul.mubr.f32.gmra.mrb[26].mxu1 %v2768_v46  ;;  %5057 = vmatmul.mubr.f32.gmra.mrb[26].mxu0 %v2766_v50 }
 0x511   : > { %4903 = vmatprep.mubr.f32.mxu1 %v2778_v3  ;;  %5059 = vmatprep.mubr.f32.mxu0 %v2776_v22  ;;  %v5401_v22 = vpack.c.bf16 %v6685_v6, %v6689_v29  ;;  %v2327_v6 = vpop.permute.xlu0 %2326 }
 0x514   : > { %4904 = vmatmul.mubr.f32.gmra.mrb[28].mxu1 %v2788_v53  ;;  %5060 = vmatmul.mubr.f32.gmra.mrb[28].mxu0 %v2786_v28 }
 0x515   : > { %4906 = vmatprep.mubr.f32.mxu1 %v2798_v8  ;;  %5062 = vmatprep.mubr.f32.mxu0 %v2796_v21  ;;  %v2337_v29 = vpop.permute.xlu0 %2336 }
 0x518   : > { %4907 = vmatmul.mubr.f32.gmra.mrb[30].mxu1 %v2808_v19  ;;  %5063 = vmatmul.mubr.f32.gmra.mrb[30].mxu0 %v2806_v10 }
 0x519   : > { %4925 = vmatprep.mubr.f32.mxu1 %v6457_v9  ;;  %5081 = vmatprep.mubr.f32.mxu0 %v6457_v9 }
 0x51c   : > { %4926 = vmatmul.mubr.f32.vlgmr.msra.gmra.mrb[8].mxu1 %v6551_v1  ;;  %5082 = vmatmul.mubr.f32.vlgmr.msra.gmra.mrb[8].mxu0 %v6551_v1 }
 0x51d   : > { %5396 = vmatpush3.bf16.msra.mxu1 %v6883_v0  ;;  %5444 = vmatpush3.bf16.msra.mxu0 %v6628_v47  ;;  %v5405_v47 = vpack.c.bf16 %v6709_v15, %v6722_v32 }
 0x51e   : > { %5398 = vmatprep.subr.bf16.mxu1 %v5397_v38  ;;  %5446 = vmatprep.subr.bf16.mxu0 %v6651_v37 }
 0x51f   : > { %4928 = vmatprep.mubr.f32.mxu1 %v6554_v58  ;;  %5084 = vmatprep.mubr.f32.mxu0 %v6554_v58 }
 0x520   : > { %4929 = vmatmul.mubr.f32.gmra.mrb[10].mxu1 %v6559_v27  ;;  %5085 = vmatmul.mubr.f32.gmra.mrb[10].mxu0 %v6559_v27 }
 0x521   : > { %5400 = vmatpush3.bf16.msra.mxu1 %v5397_v38  ;;  %5448 = vmatpush3.bf16.msra.mxu0 %v6651_v37  ;;  %v7258_v37 = vld [vmem:[#allocation8_spill] sm:$0xff] }
 0x522   : > { %5402 = vmatprep.subr.bf16.mxu1 %v5401_v22  ;;  %5450 = vmatprep.subr.bf16.mxu0 %v6687_v61 }
 0x523   : > { %4931 = vmatprep.mubr.f32.mxu1 %v6581_v43  ;;  %5087 = vmatprep.mubr.f32.mxu0 %v6581_v43 }
 0x524   : > { %4932 = vmatmul.mubr.f32.gmra.mrb[12].mxu1 %v6594_v31  ;;  %5088 = vmatmul.mubr.f32.gmra.mrb[12].mxu0 %v6594_v31 }
 0x525   : > { %5404 = vmatpush3.bf16.msra.mxu1 %v5401_v22  ;;  %5452 = vmatpush3.bf16.msra.mxu0 %v6687_v61 }
 0x526   : > { %5406 = vmatprep.subr.bf16.mxu1 %v5405_v47  ;;  %5454 = vmatprep.subr.bf16.mxu0 %v6720_v44 }
 0x527   : > { %4934 = vmatprep.mubr.f32.mxu1 %v6626_v63  ;;  %5090 = vmatprep.mubr.f32.mxu0 %v6626_v63 }
 0x528   : > { %4935 = vmatmul.mubr.f32.gmra.mrb[14].mxu1 %v6662_v12  ;;  %5091 = vmatmul.mubr.f32.gmra.mrb[14].mxu0 %v6662_v12 }
 0x529   : > { %5408 = vmatpush3.bf16.msra.mxu1 %v5405_v47  ;;  %5456 = vmatpush3.bf16.msra.mxu0 %v6720_v44 }
 0x52a   : > { %4937 = vmatprep.mubr.f32.mxu1 %v6716_v36  ;;  %5093 = vmatprep.mubr.f32.mxu0 %v6716_v36 }
 0x52c   : > { %4938 = vmatmul.mubr.f32.gmra.mrb[16].mxu1 %v6718_v62  ;;  %5094 = vmatmul.mubr.f32.gmra.mrb[16].mxu0 %v6718_v62 }
 0x52d   : > { %4940 = vmatprep.mubr.f32.mxu1 %v6758_v51  ;;  %5096 = vmatprep.mubr.f32.mxu0 %v6758_v51 }
 0x530   : > { %4941 = vmatmul.mubr.f32.gmra.mrb[18].mxu1 %v6766_v16  ;;  %5097 = vmatmul.mubr.f32.gmra.mrb[18].mxu0 %v6766_v16 }
 0x531   : > { %4943 = vmatprep.mubr.f32.mxu1 %v6791_v60  ;;  %5099 = vmatprep.mubr.f32.mxu0 %v6791_v60 }
 0x534   : > { %4944 = vmatmul.mubr.f32.gmra.mrb[20].mxu1 %v6811_v42  ;;  %5100 = vmatmul.mubr.f32.gmra.mrb[20].mxu0 %v6811_v42 }
 0x535   : > { %4946 = vmatprep.mubr.f32.mxu1 %v6813_v18  ;;  %5102 = vmatprep.mubr.f32.mxu0 %v6813_v18 }
 0x538   : > { %4947 = vmatmul.mubr.f32.gmra.mrb[22].mxu1 %v6846_v33  ;;  %5103 = vmatmul.mubr.f32.gmra.mrb[22].mxu0 %v6846_v33 }
 0x539   : > { %4949 = vmatprep.mubr.f32.mxu1 %v6858_v5  ;;  %5105 = vmatprep.mubr.f32.mxu0 %v6858_v5 }
 0x53c   : > { %4950 = vmatmul.mubr.f32.gmra.mrb[24].mxu1 %v6889_v56  ;;  %5106 = vmatmul.mubr.f32.gmra.mrb[24].mxu0 %v6889_v56 }
 0x53d   : > { %4952 = vmatprep.mubr.f32.mxu1 %v6892_v48  ;;  %5108 = vmatprep.mubr.f32.mxu0 %v6892_v48 }
 0x540   : > { %4953 = vmatmul.mubr.f32.gmra.mrb[26].mxu1 %v6915_v39  ;;  %5109 = vmatmul.mubr.f32.gmra.mrb[26].mxu0 %v6915_v39 }
 0x541   : > { %4955 = vmatprep.mubr.f32.mxu1 %v6922_v41  ;;  %5111 = vmatprep.mubr.f32.mxu0 %v6922_v41 }
 0x544   : > { %4956 = vmatmul.mubr.f32.gmra.mrb[28].mxu1 %v6935_v52  ;;  %5112 = vmatmul.mubr.f32.gmra.mrb[28].mxu0 %v6935_v52 }
 0x545   : > { %4958 = vmatprep.mubr.f32.mxu1 %v6941_v30  ;;  %5114 = vmatprep.mubr.f32.mxu0 %v6941_v30 }
 0x548   : > { %4959 = vmatmul.mubr.f32.gmra.mrb[30].mxu1 %v6949_v4  ;;  %5115 = vmatmul.mubr.f32.gmra.mrb[30].mxu0 %v6949_v4 }
 0x549   : > { %4977 = vmatprep.mubr.f32.mxu1 %v6460_v34  ;;  %5133 = vmatprep.mubr.f32.mxu0 %v6457_v9  ;;  %v7259_v9 = vld [vmem:[#allocation6_spill] sm:$0xff]  ;;  %v7260_v34 = vld [vmem:[#allocation5_spill] sm:$0xff] }
 0x54c   : > { %4978 = vmatmul.mubr.f32.vlgmr.msra.gmra.mrb[8].mxu1 %v6557_v13  ;;  %5134 = vmatmul.mubr.f32.vlgmr.msra.gmra.mrb[8].mxu0 %v6551_v1  ;;  %v7261_v1 = vld [vmem:[#allocation9_spill] sm:$0xff]  ;;  %v7263_v13 = vld [vmem:[#allocation11_spill] sm:$0xff] }
 0x54d   : > { %4980 = vmatprep.mubr.f32.mxu1 %v7257_v59  ;;  %5136 = vmatprep.mubr.f32.mxu0 %v6554_v58  ;;  %v7262_v58 = vld [vmem:[#allocation10_spill] sm:$0xff] }
 0x550   : > { %4981 = vmatmul.mubr.f32.gmra.mrb[10].mxu1 %v6577_v24  ;;  %5137 = vmatmul.mubr.f32.gmra.mrb[10].mxu0 %v6559_v27  ;;  %v7264_v27 = vld [vmem:[#allocation12_spill] sm:$0xff]  ;;  %v7265_v24 = vld [vmem:[#allocation13_spill] sm:$0xff] }
 0x551   : > { %4983 = vmatprep.mubr.f32.mxu1 %v6602_v25  ;;  %5139 = vmatprep.mubr.f32.mxu0 %v6581_v43  ;;  %v7266_v43 = vld [vmem:[#allocation14_spill] sm:$0xff]  ;;  %v7268_v25 = vld [vmem:[#allocation16_spill] sm:$0xff] }
 0x554   : > { %4984 = vmatmul.mubr.f32.gmra.mrb[12].mxu1 %v7258_v37  ;;  %5140 = vmatmul.mubr.f32.gmra.mrb[12].mxu0 %v6594_v31  ;;  %v7267_v31 = vld [vmem:[#allocation15_spill] sm:$0xff] }
 0x555   : > { %4986 = vmatprep.mubr.f32.mxu1 %v7259_v9  ;;  %5142 = vmatprep.mubr.f32.mxu0 %v6626_v63  ;;  %v7269_v63 = vld [vmem:[#allocation17_spill] sm:$0xff] }
 0x558   : > { %4987 = vmatmul.mubr.f32.gmra.mrb[14].mxu1 %v7260_v34  ;;  %5143 = vmatmul.mubr.f32.gmra.mrb[14].mxu0 %v6662_v12  ;;  %v2312_v12 = vpop.permute.xlu1 %2311 }
 0x559   : > { %4989 = vmatprep.mubr.f32.mxu1 %v7261_v1  ;;  %5145 = vmatprep.mubr.f32.mxu0 %v6716_v36 }
 0x55c   : > { %4990 = vmatmul.mubr.f32.gmra.mrb[16].mxu1 %v7262_v58  ;;  %5146 = vmatmul.mubr.f32.gmra.mrb[16].mxu0 %v6718_v62  ;;  %v2322_v61 = vpop.permute.xlu1 %2321 }
 0x55d   : > { %4992 = vmatprep.mubr.f32.mxu1 %v7263_v13  ;;  %5148 = vmatprep.mubr.f32.mxu0 %v6758_v51 }
 0x560   : > { %4993 = vmatmul.mubr.f32.gmra.mrb[18].mxu1 %v7264_v27  ;;  %5149 = vmatmul.mubr.f32.gmra.mrb[18].mxu0 %v6766_v16  ;;  %v2332_v16 = vpop.permute.xlu1 %2331 }
 0x561   : > { %4995 = vmatprep.mubr.f32.mxu1 %v7265_v24  ;;  %5151 = vmatprep.mubr.f32.mxu0 %v6791_v60 }
 0x564   : > { %4996 = vmatmul.mubr.f32.gmra.mrb[20].mxu1 %v7266_v43  ;;  %5152 = vmatmul.mubr.f32.gmra.mrb[20].mxu0 %v6811_v42  ;;  %v2342_v15 = vpop.permute.xlu1 %2341 }
 0x565   : > { %4998 = vmatprep.mubr.f32.mxu1 %v7267_v31  ;;  %5154 = vmatprep.mubr.f32.mxu0 %v6813_v18 }
 0x568   : > { %4999 = vmatmul.mubr.f32.gmra.mrb[22].mxu1 %v7268_v25  ;;  %5155 = vmatmul.mubr.f32.gmra.mrb[22].mxu0 %v6846_v33  ;;  %v2352_v62 = vpop.permute.xlu1 %2351 }
 0x569   : > { %5001 = vmatprep.mubr.f32.mxu1 %v7269_v63  ;;  %5157 = vmatprep.mubr.f32.mxu0 %v6858_v5 }
 0x56c   : > { %5002 = vmatmul.mubr.f32.gmra.mrb[24].mxu1 %v6913_v23  ;;  %5158 = vmatmul.mubr.f32.gmra.mrb[24].mxu0 %v6889_v56  ;;  %v2347_v56 = vpop.permute.xlu0 %2346  ;;  %v7078_v32 = vpop.permute.xlu1 %2361 }
 0x56d   : > { %5004 = vmatprep.mubr.f32.mxu1 %v6920_v57  ;;  %5160 = vmatprep.mubr.f32.mxu0 %v6892_v48 }
 0x570   : > { %5005 = vmatmul.mubr.f32.gmra.mrb[26].mxu1 %v6933_v49  ;;  %5161 = vmatmul.mubr.f32.gmra.mrb[26].mxu0 %v6915_v39  ;;  %v2357_v36 = vpop.permute.xlu0 %2356  ;;  %v7082_v5 = vpop.permute.xlu1 %2371 }
 0x571   : > { %5007 = vmatprep.mubr.f32.mxu1 %v6939_v45  ;;  %5163 = vmatprep.mubr.f32.mxu0 %v6922_v41 }
 0x574   : > { %5008 = vmatmul.mubr.f32.gmra.mrb[28].mxu1 %v6947_v20  ;;  %5164 = vmatmul.mubr.f32.gmra.mrb[28].mxu0 %v6935_v52  ;;  %v2367_v44 = vpop.permute.xlu0 %2366  ;;  %v2382_v55 = vpop.permute.xlu1 %2381 }
 0x575   : > { %5010 = vmatprep.mubr.f32.mxu1 %v6954_v14  ;;  %5166 = vmatprep.mubr.f32.mxu0 %v6941_v30 }
 0x578   : > { %5011 = vmatmul.mubr.f32.gmra.mrb[30].mxu1 %v6959_v26  ;;  %5167 = vmatmul.mubr.f32.gmra.mrb[30].mxu0 %v6949_v4  ;;  %v2377_v33 = vpop.permute.xlu0 %2376  ;;  %v2392_v1 = vpop.permute.xlu1 %2391 }
 0x57c   : > { %v2387_v54 = vpop.permute.xlu0 %2386 }
 0x580   : > { %v2397_v34 = vpop.permute.xlu0 %2396 }
 0x61f   : > { %v4979_v51 = vpop.f32.mrb[8].mxu1  ;;  %v5135_v57 = vpop.f32.mrb[8].mxu0 }
 0x620   : > { %v5457_v60 = vadd.f32 %v4979_v51, %v2317_v11  ;;  %v3147_v23 = vpop.f32.mrb[9].mxu1  ;;  %v3885_v42 = vpop.f32.mrb[9].mxu0 }
 0x621   : > { %v5459_v18 = vadd.f32 %v3147_v23, %v2312_v12 }
 0x622   : > { %v5458_v20 = vadd.f32 %v5457_v60, %v5135_v57 }
 0x623   : > { %v5460_v0 = vadd.f32 %v5459_v18, %v3885_v42  ;;  %v4982_v48 = vpop.f32.mrb[10].mxu1  ;;  %v5138_v39 = vpop.f32.mrb[10].mxu0 }
 0x624   : > { %4028 = vst [vmem:[%s7084_s10 + $0x8] sm:$0xff] %v5458_v20  ;;  %v5461_v41 = vadd.f32 %v4982_v48, %v2327_v6  ;;  %v3161_v49 = vpop.f32.mrb[11].mxu1  ;;  %v3897_v52 = vpop.f32.mrb[11].mxu0 }
 0x625   : > { %4027 = vst [vmem:[%s7084_s10] sm:$0xff] %v5460_v0  ;;  %v5463_v45 = vadd.f32 %v3161_v49, %v2322_v61 }
 0x626   : > { %v5462_v30 = vadd.f32 %v5461_v41, %v5138_v39 }
 0x627   : > { %v5464_v50 = vadd.f32 %v5463_v45, %v3897_v52  ;;  %v4985_v4 = vpop.f32.mrb[12].mxu1  ;;  %v5141_v14 = vpop.f32.mrb[12].mxu0 }
 0x628   : > { %4030 = vst [vmem:[%s7084_s10 + $0x18] sm:$0xff] %v5462_v30  ;;  %v5465_v40 = vadd.f32 %v4985_v4, %v2337_v29  ;;  %v3175_v35 = vpop.f32.mrb[13].mxu1  ;;  %v3909_v28 = vpop.f32.mrb[13].mxu0 }
 0x629   : > { %4029 = vst [vmem:[%s7084_s10 + $0x10] sm:$0xff] %v5464_v50  ;;  %v5467_v26 = vadd.f32 %v3175_v35, %v2332_v16 }
 0x62a   : > { %v5466_v21 = vadd.f32 %v5465_v40, %v5141_v14 }
 0x62b   : > { %v5468_v46 = vadd.f32 %v5467_v26, %v3909_v28  ;;  %v4988_v17 = vpop.f32.mrb[14].mxu1  ;;  %v5144_v10 = vpop.f32.mrb[14].mxu0 }
 0x62c   : > { %4032 = vst [vmem:[%s7084_s10 + $0x28] sm:$0xff] %v5466_v21  ;;  %v5469_v3 = vadd.f32 %v4988_v17, %v2347_v56  ;;  %v3189_v7 = vpop.f32.mrb[15].mxu1  ;;  %v3921_v53 = vpop.f32.mrb[15].mxu0 }
 0x62d   : > { %4031 = vst [vmem:[%s7084_s10 + $0x20] sm:$0xff] %v5468_v46  ;;  %v5471_v2 = vadd.f32 %v3189_v7, %v2342_v15 }
 0x62e   : > { %v5470_v8 = vadd.f32 %v5469_v3, %v5144_v10 }
 0x62f   : > { %v5472_v19 = vadd.f32 %v5471_v2, %v3921_v53  ;;  %v4991_v38 = vpop.f32.mrb[16].mxu1  ;;  %v5147_v22 = vpop.f32.mrb[16].mxu0 }
 0x630   : > { %4034 = vst [vmem:[%s7084_s10 + $0x38] sm:$0xff] %v5470_v8  ;;  %v5473_v47 = vadd.f32 %v4991_v38, %v2357_v36  ;;  %v3203_v59 = vpop.f32.mrb[17].mxu1  ;;  %v3933_v37 = vpop.f32.mrb[17].mxu0 }
 0x631   : > { %4033 = vst [vmem:[%s7084_s10 + $0x30] sm:$0xff] %v5472_v19  ;;  %v5475_v9 = vadd.f32 %v3203_v59, %v2352_v62  ;;  %v2407_v36 = vpop.permute.xlu0 %2406  ;;  %v2402_v62 = vpop.permute.xlu1 %2401 }
 0x632   : > { %v5474_v58 = vadd.f32 %v5473_v47, %v5147_v22 }
 0x633   : > { %v5476_v13 = vadd.f32 %v5475_v9, %v3933_v37  ;;  %v4994_v27 = vpop.f32.mrb[18].mxu1  ;;  %v5150_v24 = vpop.f32.mrb[18].mxu0 }
 0x634   : > { %4036 = vst [vmem:[%s7084_s10 + $0x48] sm:$0xff] %v5474_v58  ;;  %v5477_v43 = vadd.f32 %v4994_v27, %v2367_v44  ;;  %v3217_v31 = vpop.f32.mrb[19].mxu1  ;;  %v3945_v25 = vpop.f32.mrb[19].mxu0 }
 0x635   : > { %4035 = vst [vmem:[%s7084_s10 + $0x40] sm:$0xff] %v5476_v13  ;;  %v5479_v63 = vadd.f32 %v3217_v31, %v7078_v32  ;;  %v2417_v52 = vpop.permute.xlu0 %2416  ;;  %v2412_v45 = vpop.permute.xlu1 %2411 }
 0x636   : > { %v5478_v11 = vadd.f32 %v5477_v43, %v5150_v24 }
 0x637   : > { %v5480_v12 = vadd.f32 %v5479_v63, %v3945_v25  ;;  %v4997_v6 = vpop.f32.mrb[20].mxu1  ;;  %v5153_v61 = vpop.f32.mrb[20].mxu0 }
 0x638   : > { %4038 = vst [vmem:[%s7084_s10 + $0x58] sm:$0xff] %v5478_v11  ;;  %v5481_v29 = vadd.f32 %v4997_v6, %v2377_v33  ;;  %v3231_v16 = vpop.f32.mrb[21].mxu1  ;;  %v3957_v56 = vpop.f32.mrb[21].mxu0 }
 0x639   : > { %4037 = vst [vmem:[%s7084_s10 + $0x50] sm:$0xff] %v5480_v12  ;;  %v5483_v15 = vadd.f32 %v3231_v16, %v7082_v5  ;;  %v2427_v53 = vpop.permute.xlu0 %2426  ;;  %v2422_v2 = vpop.permute.xlu1 %2421 }
 0x63a   : > { %v5482_v44 = vadd.f32 %v5481_v29, %v5153_v61 }
 0x63b   : > { %v5484_v51 = vadd.f32 %v5483_v15, %v3957_v56  ;;  %v5000_v57 = vpop.f32.mrb[22].mxu1  ;;  %v5156_v32 = vpop.f32.mrb[22].mxu0 }
 0x63c   : > { %4040 = vst [vmem:[%s7084_s10 + $0x68] sm:$0xff] %v5482_v44  ;;  %v5485_v60 = vadd.f32 %v5000_v57, %v2387_v54  ;;  %v3245_v23 = vpop.f32.mrb[23].mxu1  ;;  %v3969_v42 = vpop.f32.mrb[23].mxu0 }
 0x63d   : > { %4039 = vst [vmem:[%s7084_s10 + $0x60] sm:$0xff] %v5484_v51  ;;  %v5487_v18 = vadd.f32 %v3245_v23, %v2382_v55 }
 0x63e   : > { %v5486_v33 = vadd.f32 %v5485_v60, %v5156_v32 }
 0x63f   : > { %v5488_v20 = vadd.f32 %v5487_v18, %v3969_v42  ;;  %v5003_v0 = vpop.f32.mrb[24].mxu1  ;;  %v5159_v48 = vpop.f32.mrb[24].mxu0 }
 0x640   : > { %4042 = vst [vmem:[%s7084_s10 + $0x78] sm:$0xff] %v5486_v33  ;;  %v5489_v5 = vadd.f32 %v5003_v0, %v2397_v34  ;;  %v3259_v39 = vpop.f32.mrb[25].mxu1  ;;  %v3981_v41 = vpop.f32.mrb[25].mxu0 }
 0x641   : > { %4041 = vst [vmem:[%s7084_s10 + $0x70] sm:$0xff] %v5488_v20  ;;  %v5491_v49 = vadd.f32 %v3259_v39, %v2392_v1 }
 0x642   : > { %v5490_v30 = vadd.f32 %v5489_v5, %v5159_v48 }
 0x643   : > { %v5492_v50 = vadd.f32 %v5491_v49, %v3981_v41  ;;  %v5006_v4 = vpop.f32.mrb[26].mxu1  ;;  %v5162_v14 = vpop.f32.mrb[26].mxu0 }
 0x644   : > { %4044 = vst [vmem:[%s7084_s10 + $0x88] sm:$0xff] %v5490_v30  ;;  %v5493_v40 = vadd.f32 %v5006_v4, %v2407_v36  ;;  %v3273_v35 = vpop.f32.mrb[27].mxu1  ;;  %v3993_v28 = vpop.f32.mrb[27].mxu0 }
 0x645   : > { %4043 = vst [vmem:[%s7084_s10 + $0x80] sm:$0xff] %v5492_v50  ;;  %v5495_v26 = vadd.f32 %v3273_v35, %v2402_v62 }
 0x646   : > { %v5494_v54 = vadd.f32 %v5493_v40, %v5162_v14 }
 0x647   : > { %v5496_v55 = vadd.f32 %v5495_v26, %v3993_v28  ;;  %v5009_v21 = vpop.f32.mrb[28].mxu1  ;;  %v5165_v46 = vpop.f32.mrb[28].mxu0 }
 0x648   : > { %4046 = vst [vmem:[%s7084_s10 + $0x98] sm:$0xff] %v5494_v54  ;;  %v5497_v17 = vadd.f32 %v5009_v21, %v2417_v52  ;;  %v3287_v10 = vpop.f32.mrb[29].mxu1  ;;  %v4005_v3 = vpop.f32.mrb[29].mxu0 }
 0x649   : > { %4045 = vst [vmem:[%s7084_s10 + $0x90] sm:$0xff] %v5496_v55  ;;  %v5499_v7 = vadd.f32 %v3287_v10, %v2412_v45 }
 0x64a   : > { %v5498_v8 = vadd.f32 %v5497_v17, %v5165_v46 }
 0x64b   : > { %v5500_v19 = vadd.f32 %v5499_v7, %v4005_v3  ;;  %v5012_v38 = vpop.f32.mrb[30].mxu1  ;;  %v5168_v22 = vpop.f32.mrb[30].mxu0 }
 0x64c   : > { %4048 = vst [vmem:[%s7084_s10 + $0xa8] sm:$0xff] %v5498_v8  ;;  %v5501_v47 = vadd.f32 %v5012_v38, %v2427_v53  ;;  %v3301_v59 = vpop.f32.mrb[31].mxu1  ;;  %v4017_v37 = vpop.f32.mrb[31].mxu0 }
 0x64d   : > { %4047 = vst [vmem:[%s7084_s10 + $0xa0] sm:$0xff] %v5500_v19  ;;  %v5503_v9 = vadd.f32 %v3301_v59, %v2422_v2 }
 0x64e   : > { %v5502_v34 = vadd.f32 %v5501_v47, %v5168_v22 }
 0x64f   : > { %v5504_v1 = vadd.f32 %v5503_v9, %v4017_v37 }
 0x650   : > { %4050 = vst [vmem:[%s7084_s10 + $0xb8] sm:$0xff] %v5502_v34 }
 0x651   : > { %4049 = vst [vmem:[%s7084_s10 + $0xb0] sm:$0xff] %v5504_v1 }
 0x652   : > { %5756 = shalt.err (!%p5753_p3)
}
 0x653   : > { %s5757_s20 = scalar_lea.hbm %s7117_s15, 3072  ;;  %s5761_s29 = scalar_lea.hbm %s7170_s6, 6144 }
 0x654   : > { %p5758_p4 = scmp.ne.s32.totalorder %s7117_s15, %s5757_s20  ;;  %p5762_p9 = scmp.lt.u32.totalorder %s7117_s15, %s7170_s6 }
 0x655   : > { %p5763_p10 = scmp.lt.u32.totalorder %s5761_s29, %s5757_s20  ;;  %p5765_p12 = scmp.lt.u32.totalorder %s5757_s20, %s7117_s15 }
 0x656   : > { %p5759_p7 = pnand %p5758_p4, %p5884_p5 }
 0x657   : > { %p5764_p11 = por %p5763_p10, %p5762_p9 }
 0x658   : > { %p5760_p8 = pneg %p5759_p7 }
 0x659   : > { %p5766_p13 = por %p5765_p12, %p5764_p11 }
 0x65b   : > { %p5767_p0 = pnand %p5766_p13, %p5760_p8 }
 0x65d   : > { %5770 = shalt.err (!%p5767_p0)
}
 0x65e   : > { %s5809_s11 = smov 128   ;;  %s5810_s13 = smov 8  }
 0x65f   : > { %5683 = dma.vmem_to_hbm [thread:$0]  (%p5884_p5), %s7112_s12, 3072, %s7117_s15, %s7123_s25, %s5809_s11, %s5809_s11, %s5810_s13  }
 0x660 PF: > { %p5689_p1 = scmp.ge.s32.totalorder %s5805_s24, 2  ;;  %s4080_s14 = sand.u32 1, %s5793_s21  }
 0x661   : > { %s4081_s16 = scalar_lea.sflag [#allocation3], %s4080_s14 }
 0x662   : > { %p5686_p2 = pnand %p5689_p1, %p5888_p6 }
 0x664   : > { %5788 = dma.done.wait (!%p5686_p2), %s4081_s16, 3072  }
 0x665   : > { %5790 = vsyncadd (!%p5686_p2), %s4081_s16, 4294964224  ;;  %p16_p3 = scmp.ge.s32.totalorder %s5871_s27, 4   ;;  %s7270_s21 = smov %s5797_s22 }
 0x666   : > { %s7271_s22 = smov %s5801_s23  ;;  %s7272_s23 = smov %s5882_s30 }
 0x667   : > { %s7273_s24 = smov %s5871_s27  ;;  %18 = sbr.rel (!%p16_p3) target bundleno = 3 (0x3), region = 79 }
 0x66e   :  { %4086 = vsyncpa [#allocation3], 1 }
 0x66f   :  { %4088 = vsyncpa [#allocation3 + $0x1], 1 }

</bundles_post_ra>
